<compile_context>
chip_gen: v7x
topology: tpu7x:2x2x1
jax: 0.10.0
libtpu: 0.0.40
codegen_flags: <defaults>
</compile_context>

<pallas_src>
import functools
import math

import jax
import jax.numpy as jnp
import numpy as np
from jax.experimental import pallas as pl
from jax.experimental.pallas import tpu as pltpu


# ----------------------------------------------------------------------------
# Fused kernel: L-layer LSTM recurrence (wavefront over (layer, time)) + Linear
# ----------------------------------------------------------------------------
def _fused_lstm_fc_kernel(*refs, T, Bp, H, L):
    """Ref order (all full-extent VMEM blocks, grid=(1,)):

      refs[0]                : x2d      (T*Bp, Din)   time-major input, flattened, f32
      for each layer l < L   : wih_l    (Din, 4H) for l==0, (4H, 4H) widened for l>0
                               whh_l    (4H, 4H)  widened (rows [H:) are zero)
                               b_l      (1, 4H)
      refs[1+3L], refs[2+3L] : fc_wt    (4H, O_pad) widened ; fc_b (1, O_pad)
      refs[3+3L]             : out      (Bp, O_pad)
    """
    x2d_ref = refs[0]
    layer_refs = [(refs[1 + 3 * l], refs[2 + 3 * l], refs[3 + 3 * l]) for l in range(L)]
    fc_wt_ref = refs[1 + 3 * L]
    fc_b_ref = refs[2 + 3 * L]
    out_ref = refs[3 + 3 * L]

    f32 = jnp.float32
    G = 4 * H                                        # gate width (=128 for H=32)

    # Lane mask selecting the cell-candidate (g) gate block — hoisted, constant.
    lane = jax.lax.broadcasted_iota(jnp.int32, (Bp, G), 1)
    g_mask = (lane >= 2 * H) & (lane < 3 * H)

    # Layer 0: hoisted input projection for the whole sequence — one MXU matmul,
    # bias folded in.  Each per-step row slice is a whole aligned 8-sublane group.
    wih0_ref, _, b0_ref = layer_refs[0]
    xp0 = jnp.dot(x2d_ref[...], wih0_ref[...], preferred_element_type=f32) + b0_ref[...]

    def cell(x_proj, h, c, whh_ref):
        # gates layout along lanes: [ i | f | g | o ], each H wide.
        gates = x_proj + jnp.dot(h, whh_ref[...], preferred_element_type=f32)
        # Full-width EUP passes (1 tanh + 1 sigmoid) + one vselect.
        act = jnp.where(g_mask, jnp.tanh(gates), jax.nn.sigmoid(gates))
        # Align f / g / o with the i block via XLU rolls (free slot vs VPU/EUP).
        f_al = pltpu.roll(act, 3 * H, 1)             # lanes [0:H) hold f
        g_al = pltpu.roll(act, 2 * H, 1)             # lanes [0:H) hold g
        o_al = pltpu.roll(act, 1 * H, 1)             # lanes [0:H) hold o
        # Wide update: lanes [0:H) are the real state, the rest is bounded filler
        # that the zero rows of the widened weight matrices annihilate.
        c_new = f_al * c + act * g_al
        h_new = o_al * jnp.tanh(c_new)
        return h_new, c_new

    zeros_wide = jnp.zeros((Bp, G), f32)
    h = [zeros_wide] * L
    c = [zeros_wide] * L
    xp_in = [None] * L                               # pending input-proj per layer

    # Wavefront schedule: wave w processes (l, t = w - l); higher layers first so
    # each layer consumes the projection produced for it in the previous wave.
    for w in range(T + L - 1):
        for l in range(L - 1, -1, -1):
            t = w - l
            if t < 0 or t >= T:
                continue
            _, whh_ref, _ = layer_refs[l]
            x_proj = xp0[t * Bp:(t + 1) * Bp, :] if l == 0 else xp_in[l]
            h[l], c[l] = cell(x_proj, h[l], c[l], whh_ref)
            if l + 1 < L:
                # Incremental next-layer input projection (overlaps this layer's
                # recurrence; no jnp.concatenate, no long live ranges).
                nwih_ref, _, nb_ref = layer_refs[l + 1]
                xp_in[l + 1] = (
                    jnp.dot(h[l], nwih_ref[...], preferred_element_type=f32)
                    + nb_ref[...]
                )

    # Final Linear on h of the top layer at t = T-1.  Lane-dense (O padded to 128)
    # unmasked store; widened fc weight kills the junk lanes of the wide h.
    out_ref[...] = (
        jnp.dot(h[L - 1], fc_wt_ref[...], preferred_element_type=f32) + fc_b_ref[...]
    ).astype(out_ref.dtype)


# ----------------------------------------------------------------------------
# One-time parameter packing (pre-transpose, widen, pad; all f32)
# ----------------------------------------------------------------------------
def pack_params(params):
    f32 = jnp.float32
    H = params["lstm"][0][1].shape[1]                # w_hh: (4H, H)
    G = 4 * H
    packed = {"lstm": []}
    for l, (w_ih, w_hh, b_ih, b_hh) in enumerate(params["lstm"]):
        wih_t = jnp.asarray(w_ih.T, f32)             # (Din_l, 4H)
        if l > 0:
            # Widen to (4H, 4H): zero rows for the junk lanes of the wide h.
            wih_t = jnp.zeros((G, G), f32).at[:H, :].set(wih_t)
        whh_wide = jnp.zeros((G, G), f32).at[:H, :].set(jnp.asarray(w_hh.T, f32))
        b = jnp.asarray((b_ih + b_hh).reshape(1, -1), f32)           # (1, 4H)
        packed["lstm"].append((wih_t, whh_wide, b))

    O = params["fc_w"].shape[0]
    O_pad = ((O + 127) // 128) * 128                 # lane-dense output store
    fc_wt_wide = (
        jnp.zeros((G, O_pad), f32).at[:H, :O].set(jnp.asarray(params["fc_w"].T, f32))
    )
    fc_b_pad = (
        jnp.zeros((1, O_pad), f32).at[:, :O].set(
            jnp.asarray(params["fc_b"].reshape(1, -1), f32))
    )
    packed["fc_wt"] = fc_wt_wide
    packed["fc_b"] = fc_b_pad
    return packed


# ----------------------------------------------------------------------------
# Forward wrapper (single fused pallas_call)
# ----------------------------------------------------------------------------
@functools.partial(jax.jit, static_argnames=("out_dim",))
def lstm_model_forward(x, packed, *, out_dim):
    """x: (B, T, input_dim) batch_first.  Returns (B, out_dim) f32."""
    B, T, Din = x.shape
    L = len(packed["lstm"])
    G = packed["lstm"][0][1].shape[1]                # whh_wide is (4H, 4H)
    H = G // 4
    O_pad = packed["fc_wt"].shape[1]

    # Pad the batch to a full sublane group so every per-step tensor is an
    # aligned (8, 128) vreg.  Padded rows are independent and sliced off below.
    Bp = ((B + 7) // 8) * 8
    x_p = jnp.pad(x.astype(jnp.float32), ((0, Bp - B), (0, 0), (0, 0)))
    # batch_first -> time-major, flattened over (t, b).
    x2d = jnp.transpose(x_p, (1, 0, 2)).reshape(T * Bp, Din)

    inputs = [x2d]
    in_specs = [pl.BlockSpec((T * Bp, Din), lambda i: (0, 0))]
    for (wih, whh, b) in packed["lstm"]:
        inputs += [wih, whh, b]
        in_specs += [
            pl.BlockSpec(wih.shape, lambda i: (0, 0)),
            pl.BlockSpec(whh.shape, lambda i: (0, 0)),
            pl.BlockSpec(b.shape, lambda i: (0, 0)),
        ]
    inputs += [packed["fc_wt"], packed["fc_b"]]
    in_specs += [
        pl.BlockSpec(packed["fc_wt"].shape, lambda i: (0, 0)),
        pl.BlockSpec(packed["fc_b"].shape, lambda i: (0, 0)),
    ]

    kernel = functools.partial(_fused_lstm_fc_kernel, T=T, Bp=Bp, H=H, L=L)

    # NOTE: at large batch, add a leading "parallel" batch grid axis here to
    # exploit v7x's 2 TensorCores; at B=2 a single grid point is optimal.
    out_full = pl.pallas_call(
        kernel,
        out_shape=jax.ShapeDtypeStruct((Bp, O_pad), jnp.float32),
        grid=(1,),
        in_specs=in_specs,
        out_specs=pl.BlockSpec((Bp, O_pad), lambda i: (0, 0)),
        compiler_params=pltpu.CompilerParams(
            dimension_semantics=("arbitrary",),
            vmem_limit_bytes=32 * 1024 * 1024,       # fits v5e/v6e/v7x scoped VMEM
        ),
    )(*inputs)

    return out_full[:B, :out_dim]


# ----------------------------------------------------------------------------
# Deterministic parameter construction (PyTorch-style uniform init)
# ----------------------------------------------------------------------------
def init_params(key, input_dim, hidden_dim, layer_dim, output_dim):
    params = {"lstm": []}
    k = 1.0 / math.sqrt(hidden_dim)
    for layer in range(layer_dim):
        d_in = input_dim if layer == 0 else hidden_dim
        key, k1, k2, k3, k4 = jax.random.split(key, 5)
        w_ih = jax.random.uniform(k1, (4 * hidden_dim, d_in), jnp.float32, -k, k)
        w_hh = jax.random.uniform(k2, (4 * hidden_dim, hidden_dim), jnp.float32, -k, k)
        b_ih = jax.random.uniform(k3, (4 * hidden_dim,), jnp.float32, -k, k)
        b_hh = jax.random.uniform(k4, (4 * hidden_dim,), jnp.float32, -k, k)
        params["lstm"].append((w_ih, w_hh, b_ih, b_hh))
    key, k5, k6 = jax.random.split(key, 3)
    params["fc_w"] = jax.random.uniform(k5, (output_dim, hidden_dim), jnp.float32, -k, k)
    params["fc_b"] = jax.random.uniform(k6, (output_dim,), jnp.float32, -k, k)
    return params


# ----------------------------------------------------------------------------
# Pure-JAX f32 reference (reproduces the PyTorch module semantics)
# ----------------------------------------------------------------------------
def reference_forward(x, params):
    hp = jax.lax.Precision.HIGHEST
    B = x.shape[0]
    seq = x.astype(jnp.float32)                      # (B, T, D)
    for (w_ih, w_hh, b_ih, b_hh) in params["lstm"]:
        H = w_hh.shape[1]
        b = (b_ih + b_hh)[None, :]
        h = jnp.zeros((B, H), jnp.float32)
        c = jnp.zeros((B, H), jnp.float32)
        outs = []
        for t in range(seq.shape[1]):
            g = (jnp.dot(seq[:, t, :], w_ih.T, precision=hp)
                 + jnp.dot(h, w_hh.T, precision=hp) + b)
            i = jax.nn.sigmoid(g[:, 0 * H:1 * H])
            f = jax.nn.sigmoid(g[:, 1 * H:2 * H])
            gg = jnp.tanh(g[:, 2 * H:3 * H])
            o = jax.nn.sigmoid(g[:, 3 * H:4 * H])
            c = f * c + i * gg
            h = o * jnp.tanh(c)
            outs.append(h)
        seq = jnp.stack(outs, axis=1)
    return jnp.dot(seq[:, -1, :], params["fc_w"].T, precision=hp) + params["fc_b"][None, :]


# ----------------------------------------------------------------------------
if __name__ == "__main__":
    # Small shapes consistent with the module: batch=2, seq=8, input_dim=4,
    # hidden_dim=32, layer_dim=2, output_dim=1.
    B, T, D, H, L, O = 2, 8, 4, 32, 2, 1

    key = jax.random.PRNGKey(0)
    key, kx = jax.random.split(key)
    x = jax.random.normal(kx, (B, T, D), dtype=jnp.float32)
    params = init_params(key, D, H, L, O)

    packed = pack_params(params)                     # one-time pack (f32, widened)

    out = lstm_model_forward(x, packed, out_dim=O)
    out = jax.block_until_ready(out)
    assert out.shape == (B, O)

    # PyTorch-faithful f32 reference.
    ref = reference_forward(x, params)
    assert np.allclose(np.asarray(out), np.asarray(ref), atol=2e-2, rtol=2e-2)

    print("KERNEL_OK")
</pallas_src>

<mosaic_0001>
module attributes {stable_mosaic.version = 11 : i64} {
  func.func @_fused_lstm_fc_kernel(%arg0: i32, %arg1: memref<64x4xf32, #tpu.memory_space<vmem>>, %arg2: memref<4x128xf32, #tpu.memory_space<vmem>>, %arg3: memref<128x128xf32, #tpu.memory_space<vmem>>, %arg4: memref<1x128xf32, #tpu.memory_space<vmem>>, %arg5: memref<128x128xf32, #tpu.memory_space<vmem>>, %arg6: memref<128x128xf32, #tpu.memory_space<vmem>>, %arg7: memref<1x128xf32, #tpu.memory_space<vmem>>, %arg8: memref<128x128xf32, #tpu.memory_space<vmem>>, %arg9: memref<1x128xf32, #tpu.memory_space<vmem>>, %arg10: memref<8x128xf32, #tpu.memory_space<vmem>>) attributes {dimension_semantics = [#tpu.dimension_semantics<arbitrary>], iteration_bounds = array<i64: 1>, scalar_prefetch = 0 : i64, scratch_operands = 0 : i64, tpu.core_type = #tpu.core_type<tc>, window_params = [{pipeline_mode = #tpu.pipeline_mode<synchronous>, transform_indices = @transform_0, window_bounds = array<i64: 64, 4>}, {pipeline_mode = #tpu.pipeline_mode<synchronous>, transform_indices = @transform_1, window_bounds = array<i64: 4, 128>}, {pipeline_mode = #tpu.pipeline_mode<synchronous>, transform_indices = @transform_2, window_bounds = array<i64: 128, 128>}, {pipeline_mode = #tpu.pipeline_mode<synchronous>, transform_indices = @transform_3, window_bounds = array<i64: 1, 128>}, {pipeline_mode = #tpu.pipeline_mode<synchronous>, transform_indices = @transform_4, window_bounds = array<i64: 128, 128>}, {pipeline_mode = #tpu.pipeline_mode<synchronous>, transform_indices = @transform_5, window_bounds = array<i64: 128, 128>}, {pipeline_mode = #tpu.pipeline_mode<synchronous>, transform_indices = @transform_6, window_bounds = array<i64: 1, 128>}, {pipeline_mode = #tpu.pipeline_mode<synchronous>, transform_indices = @transform_7, window_bounds = array<i64: 128, 128>}, {pipeline_mode = #tpu.pipeline_mode<synchronous>, transform_indices = @transform_8, window_bounds = array<i64: 1, 128>}, {pipeline_mode = #tpu.pipeline_mode<synchronous>, transform_indices = @transform_9, window_bounds = array<i64: 8, 128>}]} {
    %0 = tpu.iota {dimensions = array<i32: 1>} : vector<8x128xi32>
    %c64_i32 = arith.constant 64 : i32
    %1 = vector.broadcast %c64_i32 : i32 to vector<8x128xi32>
    %2 = arith.cmpi sge, %0, %1 : vector<8x128xi32>
    %c96_i32 = arith.constant 96 : i32
    %3 = vector.broadcast %c96_i32 : i32 to vector<8x128xi32>
    %4 = arith.cmpi slt, %0, %3 : vector<8x128xi32>
    %5 = arith.andi %2, %4 : vector<8x128xi1>
    %c0 = arith.constant 0 : index
    %c0_0 = arith.constant 0 : index
    %6 = vector.load %arg1[%c0, %c0_0] : memref<64x4xf32, #tpu.memory_space<vmem>>, vector<64x4xf32>
    %c0_1 = arith.constant 0 : index
    %c0_2 = arith.constant 0 : index
    %7 = vector.load %arg2[%c0_1, %c0_2] : memref<4x128xf32, #tpu.memory_space<vmem>>, vector<4x128xf32>
    %cst = arith.constant dense<0.000000e+00> : vector<64x128xf32>
    %8 = tpu.matmul %6, %7, %cst {dimension_numbers = #tpu.dot_dimension_numbers<[1], [0], [0], [1], [0, 0, 1, 1], [], []>} : vector<64x4xf32>, vector<4x128xf32>, vector<64x128xf32> -> vector<64x128xf32>
    %c0_3 = arith.constant 0 : index
    %c0_4 = arith.constant 0 : index
    %9 = vector.load %arg4[%c0_3, %c0_4] : memref<1x128xf32, #tpu.memory_space<vmem>>, vector<1x128xf32>
    %10 = vector.broadcast %9 : vector<1x128xf32> to vector<64x128xf32>
    %11 = arith.addf %8, %10 : vector<64x128xf32>
    %cst_5 = arith.constant 0.000000e+00 : f32
    %12 = vector.broadcast %cst_5 : f32 to vector<8x128xf32>
    %13 = vector.extract_strided_slice %11 {offsets = [0, 0], sizes = [8, 128], strides = [1, 1]} : vector<64x128xf32> to vector<8x128xf32>
    %c0_6 = arith.constant 0 : index
    %c0_7 = arith.constant 0 : index
    %14 = vector.load %arg3[%c0_6, %c0_7] : memref<128x128xf32, #tpu.memory_space<vmem>>, vector<128x128xf32>
    %cst_8 = arith.constant dense<0.000000e+00> : vector<8x128xf32>
    %15 = tpu.matmul %12, %14, %cst_8 {dimension_numbers = #tpu.dot_dimension_numbers<[1], [0], [0], [1], [0, 0, 1, 1], [], []>} : vector<8x128xf32>, vector<128x128xf32>, vector<8x128xf32> -> vector<8x128xf32>
    %16 = arith.addf %13, %15 : vector<8x128xf32>
    %17 = math.tanh %16 : vector<8x128xf32>
    %18 = arith.negf %16 : vector<8x128xf32>
    %19 = math.exp %18 : vector<8x128xf32>
    %cst_9 = arith.constant 1.000000e+00 : f32
    %20 = vector.broadcast %cst_9 : f32 to vector<8x128xf32>
    %21 = arith.addf %20, %19 : vector<8x128xf32>
    %22 = arith.divf %20, %21 : vector<8x128xf32>
    %23 = arith.select %5, %17, %22 : vector<8x128xi1>, vector<8x128xf32>
    %c96_i32_10 = arith.constant 96 : i32
    %24 = tpu.dynamic_rotate %23 by %c96_i32_10 dim 1 : vector<8x128xf32>, i32 -> vector<8x128xf32>
    %c64_i32_11 = arith.constant 64 : i32
    %25 = tpu.dynamic_rotate %23 by %c64_i32_11 dim 1 : vector<8x128xf32>, i32 -> vector<8x128xf32>
    %c32_i32 = arith.constant 32 : i32
    %26 = tpu.dynamic_rotate %23 by %c32_i32 dim 1 : vector<8x128xf32>, i32 -> vector<8x128xf32>
    %27 = arith.mulf %24, %12 : vector<8x128xf32>
    %28 = arith.mulf %23, %25 : vector<8x128xf32>
    %29 = arith.addf %27, %28 : vector<8x128xf32>
    %30 = math.tanh %29 : vector<8x128xf32>
    %31 = arith.mulf %26, %30 : vector<8x128xf32>
    %c0_12 = arith.constant 0 : index
    %c0_13 = arith.constant 0 : index
    %32 = vector.load %arg5[%c0_12, %c0_13] : memref<128x128xf32, #tpu.memory_space<vmem>>, vector<128x128xf32>
    %cst_14 = arith.constant dense<0.000000e+00> : vector<8x128xf32>
    %33 = tpu.matmul %31, %32, %cst_14 {dimension_numbers = #tpu.dot_dimension_numbers<[1], [0], [0], [1], [0, 0, 1, 1], [], []>} : vector<8x128xf32>, vector<128x128xf32>, vector<8x128xf32> -> vector<8x128xf32>
    %c0_15 = arith.constant 0 : index
    %c0_16 = arith.constant 0 : index
    %34 = vector.load %arg7[%c0_15, %c0_16] : memref<1x128xf32, #tpu.memory_space<vmem>>, vector<1x128xf32>
    %35 = vector.broadcast %34 : vector<1x128xf32> to vector<8x128xf32>
    %36 = arith.addf %33, %35 : vector<8x128xf32>
    %c0_17 = arith.constant 0 : index
    %c0_18 = arith.constant 0 : index
    %37 = vector.load %arg6[%c0_17, %c0_18] : memref<128x128xf32, #tpu.memory_space<vmem>>, vector<128x128xf32>
    %cst_19 = arith.constant dense<0.000000e+00> : vector<8x128xf32>
    %38 = tpu.matmul %12, %37, %cst_19 {dimension_numbers = #tpu.dot_dimension_numbers<[1], [0], [0], [1], [0, 0, 1, 1], [], []>} : vector<8x128xf32>, vector<128x128xf32>, vector<8x128xf32> -> vector<8x128xf32>
    %39 = arith.addf %36, %38 : vector<8x128xf32>
    %40 = math.tanh %39 : vector<8x128xf32>
    %41 = arith.negf %39 : vector<8x128xf32>
    %42 = math.exp %41 : vector<8x128xf32>
    %cst_20 = arith.constant 1.000000e+00 : f32
    %43 = vector.broadcast %cst_20 : f32 to vector<8x128xf32>
    %44 = arith.addf %43, %42 : vector<8x128xf32>
    %45 = arith.divf %43, %44 : vector<8x128xf32>
    %46 = arith.select %5, %40, %45 : vector<8x128xi1>, vector<8x128xf32>
    %c96_i32_21 = arith.constant 96 : i32
    %47 = tpu.dynamic_rotate %46 by %c96_i32_21 dim 1 : vector<8x128xf32>, i32 -> vector<8x128xf32>
    %c64_i32_22 = arith.constant 64 : i32
    %48 = tpu.dynamic_rotate %46 by %c64_i32_22 dim 1 : vector<8x128xf32>, i32 -> vector<8x128xf32>
    %c32_i32_23 = arith.constant 32 : i32
    %49 = tpu.dynamic_rotate %46 by %c32_i32_23 dim 1 : vector<8x128xf32>, i32 -> vector<8x128xf32>
    %50 = arith.mulf %47, %12 : vector<8x128xf32>
    %51 = arith.mulf %46, %48 : vector<8x128xf32>
    %52 = arith.addf %50, %51 : vector<8x128xf32>
    %53 = math.tanh %52 : vector<8x128xf32>
    %54 = arith.mulf %49, %53 : vector<8x128xf32>
    %55 = vector.extract_strided_slice %11 {offsets = [8, 0], sizes = [8, 128], strides = [1, 1]} : vector<64x128xf32> to vector<8x128xf32>
    %c0_24 = arith.constant 0 : index
    %c0_25 = arith.constant 0 : index
    %56 = vector.load %arg3[%c0_24, %c0_25] : memref<128x128xf32, #tpu.memory_space<vmem>>, vector<128x128xf32>
    %cst_26 = arith.constant dense<0.000000e+00> : vector<8x128xf32>
    %57 = tpu.matmul %31, %56, %cst_26 {dimension_numbers = #tpu.dot_dimension_numbers<[1], [0], [0], [1], [0, 0, 1, 1], [], []>} : vector<8x128xf32>, vector<128x128xf32>, vector<8x128xf32> -> vector<8x128xf32>
    %58 = arith.addf %55, %57 : vector<8x128xf32>
    %59 = math.tanh %58 : vector<8x128xf32>
    %60 = arith.negf %58 : vector<8x128xf32>
    %61 = math.exp %60 : vector<8x128xf32>
    %cst_27 = arith.constant 1.000000e+00 : f32
    %62 = vector.broadcast %cst_27 : f32 to vector<8x128xf32>
    %63 = arith.addf %62, %61 : vector<8x128xf32>
    %64 = arith.divf %62, %63 : vector<8x128xf32>
    %65 = arith.select %5, %59, %64 : vector<8x128xi1>, vector<8x128xf32>
    %c96_i32_28 = arith.constant 96 : i32
    %66 = tpu.dynamic_rotate %65 by %c96_i32_28 dim 1 : vector<8x128xf32>, i32 -> vector<8x128xf32>
    %c64_i32_29 = arith.constant 64 : i32
    %67 = tpu.dynamic_rotate %65 by %c64_i32_29 dim 1 : vector<8x128xf32>, i32 -> vector<8x128xf32>
    %c32_i32_30 = arith.constant 32 : i32
    %68 = tpu.dynamic_rotate %65 by %c32_i32_30 dim 1 : vector<8x128xf32>, i32 -> vector<8x128xf32>
    %69 = arith.mulf %66, %29 : vector<8x128xf32>
    %70 = arith.mulf %65, %67 : vector<8x128xf32>
    %71 = arith.addf %69, %70 : vector<8x128xf32>
    %72 = math.tanh %71 : vector<8x128xf32>
    %73 = arith.mulf %68, %72 : vector<8x128xf32>
    %c0_31 = arith.constant 0 : index
    %c0_32 = arith.constant 0 : index
    %74 = vector.load %arg5[%c0_31, %c0_32] : memref<128x128xf32, #tpu.memory_space<vmem>>, vector<128x128xf32>
    %cst_33 = arith.constant dense<0.000000e+00> : vector<8x128xf32>
    %75 = tpu.matmul %73, %74, %cst_33 {dimension_numbers = #tpu.dot_dimension_numbers<[1], [0], [0], [1], [0, 0, 1, 1], [], []>} : vector<8x128xf32>, vector<128x128xf32>, vector<8x128xf32> -> vector<8x128xf32>
    %c0_34 = arith.constant 0 : index
    %c0_35 = arith.constant 0 : index
    %76 = vector.load %arg7[%c0_34, %c0_35] : memref<1x128xf32, #tpu.memory_space<vmem>>, vector<1x128xf32>
    %77 = vector.broadcast %76 : vector<1x128xf32> to vector<8x128xf32>
    %78 = arith.addf %75, %77 : vector<8x128xf32>
    %c0_36 = arith.constant 0 : index
    %c0_37 = arith.constant 0 : index
    %79 = vector.load %arg6[%c0_36, %c0_37] : memref<128x128xf32, #tpu.memory_space<vmem>>, vector<128x128xf32>
    %cst_38 = arith.constant dense<0.000000e+00> : vector<8x128xf32>
    %80 = tpu.matmul %54, %79, %cst_38 {dimension_numbers = #tpu.dot_dimension_numbers<[1], [0], [0], [1], [0, 0, 1, 1], [], []>} : vector<8x128xf32>, vector<128x128xf32>, vector<8x128xf32> -> vector<8x128xf32>
    %81 = arith.addf %78, %80 : vector<8x128xf32>
    %82 = math.tanh %81 : vector<8x128xf32>
    %83 = arith.negf %81 : vector<8x128xf32>
    %84 = math.exp %83 : vector<8x128xf32>
    %cst_39 = arith.constant 1.000000e+00 : f32
    %85 = vector.broadcast %cst_39 : f32 to vector<8x128xf32>
    %86 = arith.addf %85, %84 : vector<8x128xf32>
    %87 = arith.divf %85, %86 : vector<8x128xf32>
    %88 = arith.select %5, %82, %87 : vector<8x128xi1>, vector<8x128xf32>
    %c96_i32_40 = arith.constant 96 : i32
    %89 = tpu.dynamic_rotate %88 by %c96_i32_40 dim 1 : vector<8x128xf32>, i32 -> vector<8x128xf32>
    %c64_i32_41 = arith.constant 64 : i32
    %90 = tpu.dynamic_rotate %88 by %c64_i32_41 dim 1 : vector<8x128xf32>, i32 -> vector<8x128xf32>
    %c32_i32_42 = arith.constant 32 : i32
    %91 = tpu.dynamic_rotate %88 by %c32_i32_42 dim 1 : vector<8x128xf32>, i32 -> vector<8x128xf32>
    %92 = arith.mulf %89, %52 : vector<8x128xf32>
    %93 = arith.mulf %88, %90 : vector<8x128xf32>
    %94 = arith.addf %92, %93 : vector<8x128xf32>
    %95 = math.tanh %94 : vector<8x128xf32>
    %96 = arith.mulf %91, %95 : vector<8x128xf32>
    %97 = vector.extract_strided_slice %11 {offsets = [16, 0], sizes = [8, 128], strides = [1, 1]} : vector<64x128xf32> to vector<8x128xf32>
    %c0_43 = arith.constant 0 : index
    %c0_44 = arith.constant 0 : index
    %98 = vector.load %arg3[%c0_43, %c0_44] : memref<128x128xf32, #tpu.memory_space<vmem>>, vector<128x128xf32>
    %cst_45 = arith.constant dense<0.000000e+00> : vector<8x128xf32>
    %99 = tpu.matmul %73, %98, %cst_45 {dimension_numbers = #tpu.dot_dimension_numbers<[1], [0], [0], [1], [0, 0, 1, 1], [], []>} : vector<8x128xf32>, vector<128x128xf32>, vector<8x128xf32> -> vector<8x128xf32>
    %100 = arith.addf %97, %99 : vector<8x128xf32>
    %101 = math.tanh %100 : vector<8x128xf32>
    %102 = arith.negf %100 : vector<8x128xf32>
    %103 = math.exp %102 : vector<8x128xf32>
    %cst_46 = arith.constant 1.000000e+00 : f32
    %104 = vector.broadcast %cst_46 : f32 to vector<8x128xf32>
    %105 = arith.addf %104, %103 : vector<8x128xf32>
    %106 = arith.divf %104, %105 : vector<8x128xf32>
    %107 = arith.select %5, %101, %106 : vector<8x128xi1>, vector<8x128xf32>
    %c96_i32_47 = arith.constant 96 : i32
    %108 = tpu.dynamic_rotate %107 by %c96_i32_47 dim 1 : vector<8x128xf32>, i32 -> vector<8x128xf32>
    %c64_i32_48 = arith.constant 64 : i32
    %109 = tpu.dynamic_rotate %107 by %c64_i32_48 dim 1 : vector<8x128xf32>, i32 -> vector<8x128xf32>
    %c32_i32_49 = arith.constant 32 : i32
    %110 = tpu.dynamic_rotate %107 by %c32_i32_49 dim 1 : vector<8x128xf32>, i32 -> vector<8x128xf32>
    %111 = arith.mulf %108, %71 : vector<8x128xf32>
    %112 = arith.mulf %107, %109 : vector<8x128xf32>
    %113 = arith.addf %111, %112 : vector<8x128xf32>
    %114 = math.tanh %113 : vector<8x128xf32>
    %115 = arith.mulf %110, %114 : vector<8x128xf32>
    %c0_50 = arith.constant 0 : index
    %c0_51 = arith.constant 0 : index
    %116 = vector.load %arg5[%c0_50, %c0_51] : memref<128x128xf32, #tpu.memory_space<vmem>>, vector<128x128xf32>
    %cst_52 = arith.constant dense<0.000000e+00> : vector<8x128xf32>
    %117 = tpu.matmul %115, %116, %cst_52 {dimension_numbers = #tpu.dot_dimension_numbers<[1], [0], [0], [1], [0, 0, 1, 1], [], []>} : vector<8x128xf32>, vector<128x128xf32>, vector<8x128xf32> -> vector<8x128xf32>
    %c0_53 = arith.constant 0 : index
    %c0_54 = arith.constant 0 : index
    %118 = vector.load %arg7[%c0_53, %c0_54] : memref<1x128xf32, #tpu.memory_space<vmem>>, vector<1x128xf32>
    %119 = vector.broadcast %118 : vector<1x128xf32> to vector<8x128xf32>
    %120 = arith.addf %117, %119 : vector<8x128xf32>
    %c0_55 = arith.constant 0 : index
    %c0_56 = arith.constant 0 : index
    %121 = vector.load %arg6[%c0_55, %c0_56] : memref<128x128xf32, #tpu.memory_space<vmem>>, vector<128x128xf32>
    %cst_57 = arith.constant dense<0.000000e+00> : vector<8x128xf32>
    %122 = tpu.matmul %96, %121, %cst_57 {dimension_numbers = #tpu.dot_dimension_numbers<[1], [0], [0], [1], [0, 0, 1, 1], [], []>} : vector<8x128xf32>, vector<128x128xf32>, vector<8x128xf32> -> vector<8x128xf32>
    %123 = arith.addf %120, %122 : vector<8x128xf32>
    %124 = math.tanh %123 : vector<8x128xf32>
    %125 = arith.negf %123 : vector<8x128xf32>
    %126 = math.exp %125 : vector<8x128xf32>
    %cst_58 = arith.constant 1.000000e+00 : f32
    %127 = vector.broadcast %cst_58 : f32 to vector<8x128xf32>
    %128 = arith.addf %127, %126 : vector<8x128xf32>
    %129 = arith.divf %127, %128 : vector<8x128xf32>
    %130 = arith.select %5, %124, %129 : vector<8x128xi1>, vector<8x128xf32>
    %c96_i32_59 = arith.constant 96 : i32
    %131 = tpu.dynamic_rotate %130 by %c96_i32_59 dim 1 : vector<8x128xf32>, i32 -> vector<8x128xf32>
    %c64_i32_60 = arith.constant 64 : i32
    %132 = tpu.dynamic_rotate %130 by %c64_i32_60 dim 1 : vector<8x128xf32>, i32 -> vector<8x128xf32>
    %c32_i32_61 = arith.constant 32 : i32
    %133 = tpu.dynamic_rotate %130 by %c32_i32_61 dim 1 : vector<8x128xf32>, i32 -> vector<8x128xf32>
    %134 = arith.mulf %131, %94 : vector<8x128xf32>
    %135 = arith.mulf %130, %132 : vector<8x128xf32>
    %136 = arith.addf %134, %135 : vector<8x128xf32>
    %137 = math.tanh %136 : vector<8x128xf32>
    %138 = arith.mulf %133, %137 : vector<8x128xf32>
    %139 = vector.extract_strided_slice %11 {offsets = [24, 0], sizes = [8, 128], strides = [1, 1]} : vector<64x128xf32> to vector<8x128xf32>
    %c0_62 = arith.constant 0 : index
    %c0_63 = arith.constant 0 : index
    %140 = vector.load %arg3[%c0_62, %c0_63] : memref<128x128xf32, #tpu.memory_space<vmem>>, vector<128x128xf32>
    %cst_64 = arith.constant dense<0.000000e+00> : vector<8x128xf32>
    %141 = tpu.matmul %115, %140, %cst_64 {dimension_numbers = #tpu.dot_dimension_numbers<[1], [0], [0], [1], [0, 0, 1, 1], [], []>} : vector<8x128xf32>, vector<128x128xf32>, vector<8x128xf32> -> vector<8x128xf32>
    %142 = arith.addf %139, %141 : vector<8x128xf32>
    %143 = math.tanh %142 : vector<8x128xf32>
    %144 = arith.negf %142 : vector<8x128xf32>
    %145 = math.exp %144 : vector<8x128xf32>
    %cst_65 = arith.constant 1.000000e+00 : f32
    %146 = vector.broadcast %cst_65 : f32 to vector<8x128xf32>
    %147 = arith.addf %146, %145 : vector<8x128xf32>
    %148 = arith.divf %146, %147 : vector<8x128xf32>
    %149 = arith.select %5, %143, %148 : vector<8x128xi1>, vector<8x128xf32>
    %c96_i32_66 = arith.constant 96 : i32
    %150 = tpu.dynamic_rotate %149 by %c96_i32_66 dim 1 : vector<8x128xf32>, i32 -> vector<8x128xf32>
    %c64_i32_67 = arith.constant 64 : i32
    %151 = tpu.dynamic_rotate %149 by %c64_i32_67 dim 1 : vector<8x128xf32>, i32 -> vector<8x128xf32>
    %c32_i32_68 = arith.constant 32 : i32
    %152 = tpu.dynamic_rotate %149 by %c32_i32_68 dim 1 : vector<8x128xf32>, i32 -> vector<8x128xf32>
    %153 = arith.mulf %150, %113 : vector<8x128xf32>
    %154 = arith.mulf %149, %151 : vector<8x128xf32>
    %155 = arith.addf %153, %154 : vector<8x128xf32>
    %156 = math.tanh %155 : vector<8x128xf32>
    %157 = arith.mulf %152, %156 : vector<8x128xf32>
    %c0_69 = arith.constant 0 : index
    %c0_70 = arith.constant 0 : index
    %158 = vector.load %arg5[%c0_69, %c0_70] : memref<128x128xf32, #tpu.memory_space<vmem>>, vector<128x128xf32>
    %cst_71 = arith.constant dense<0.000000e+00> : vector<8x128xf32>
    %159 = tpu.matmul %157, %158, %cst_71 {dimension_numbers = #tpu.dot_dimension_numbers<[1], [0], [0], [1], [0, 0, 1, 1], [], []>} : vector<8x128xf32>, vector<128x128xf32>, vector<8x128xf32> -> vector<8x128xf32>
    %c0_72 = arith.constant 0 : index
    %c0_73 = arith.constant 0 : index
    %160 = vector.load %arg7[%c0_72, %c0_73] : memref<1x128xf32, #tpu.memory_space<vmem>>, vector<1x128xf32>
    %161 = vector.broadcast %160 : vector<1x128xf32> to vector<8x128xf32>
    %162 = arith.addf %159, %161 : vector<8x128xf32>
    %c0_74 = arith.constant 0 : index
    %c0_75 = arith.constant 0 : index
    %163 = vector.load %arg6[%c0_74, %c0_75] : memref<128x128xf32, #tpu.memory_space<vmem>>, vector<128x128xf32>
    %cst_76 = arith.constant dense<0.000000e+00> : vector<8x128xf32>
    %164 = tpu.matmul %138, %163, %cst_76 {dimension_numbers = #tpu.dot_dimension_numbers<[1], [0], [0], [1], [0, 0, 1, 1], [], []>} : vector<8x128xf32>, vector<128x128xf32>, vector<8x128xf32> -> vector<8x128xf32>
    %165 = arith.addf %162, %164 : vector<8x128xf32>
    %166 = math.tanh %165 : vector<8x128xf32>
    %167 = arith.negf %165 : vector<8x128xf32>
    %168 = math.exp %167 : vector<8x128xf32>
    %cst_77 = arith.constant 1.000000e+00 : f32
    %169 = vector.broadcast %cst_77 : f32 to vector<8x128xf32>
    %170 = arith.addf %169, %168 : vector<8x128xf32>
    %171 = arith.divf %169, %170 : vector<8x128xf32>
    %172 = arith.select %5, %166, %171 : vector<8x128xi1>, vector<8x128xf32>
    %c96_i32_78 = arith.constant 96 : i32
    %173 = tpu.dynamic_rotate %172 by %c96_i32_78 dim 1 : vector<8x128xf32>, i32 -> vector<8x128xf32>
    %c64_i32_79 = arith.constant 64 : i32
    %174 = tpu.dynamic_rotate %172 by %c64_i32_79 dim 1 : vector<8x128xf32>, i32 -> vector<8x128xf32>
    %c32_i32_80 = arith.constant 32 : i32
    %175 = tpu.dynamic_rotate %172 by %c32_i32_80 dim 1 : vector<8x128xf32>, i32 -> vector<8x128xf32>
    %176 = arith.mulf %173, %136 : vector<8x128xf32>
    %177 = arith.mulf %172, %174 : vector<8x128xf32>
    %178 = arith.addf %176, %177 : vector<8x128xf32>
    %179 = math.tanh %178 : vector<8x128xf32>
    %180 = arith.mulf %175, %179 : vector<8x128xf32>
    %181 = vector.extract_strided_slice %11 {offsets = [32, 0], sizes = [8, 128], strides = [1, 1]} : vector<64x128xf32> to vector<8x128xf32>
    %c0_81 = arith.constant 0 : index
    %c0_82 = arith.constant 0 : index
    %182 = vector.load %arg3[%c0_81, %c0_82] : memref<128x128xf32, #tpu.memory_space<vmem>>, vector<128x128xf32>
    %cst_83 = arith.constant dense<0.000000e+00> : vector<8x128xf32>
    %183 = tpu.matmul %157, %182, %cst_83 {dimension_numbers = #tpu.dot_dimension_numbers<[1], [0], [0], [1], [0, 0, 1, 1], [], []>} : vector<8x128xf32>, vector<128x128xf32>, vector<8x128xf32> -> vector<8x128xf32>
    %184 = arith.addf %181, %183 : vector<8x128xf32>
    %185 = math.tanh %184 : vector<8x128xf32>
    %186 = arith.negf %184 : vector<8x128xf32>
    %187 = math.exp %186 : vector<8x128xf32>
    %cst_84 = arith.constant 1.000000e+00 : f32
    %188 = vector.broadcast %cst_84 : f32 to vector<8x128xf32>
    %189 = arith.addf %188, %187 : vector<8x128xf32>
    %190 = arith.divf %188, %189 : vector<8x128xf32>
    %191 = arith.select %5, %185, %190 : vector<8x128xi1>, vector<8x128xf32>
    %c96_i32_85 = arith.constant 96 : i32
    %192 = tpu.dynamic_rotate %191 by %c96_i32_85 dim 1 : vector<8x128xf32>, i32 -> vector<8x128xf32>
    %c64_i32_86 = arith.constant 64 : i32
    %193 = tpu.dynamic_rotate %191 by %c64_i32_86 dim 1 : vector<8x128xf32>, i32 -> vector<8x128xf32>
    %c32_i32_87 = arith.constant 32 : i32
    %194 = tpu.dynamic_rotate %191 by %c32_i32_87 dim 1 : vector<8x128xf32>, i32 -> vector<8x128xf32>
    %195 = arith.mulf %192, %155 : vector<8x128xf32>
    %196 = arith.mulf %191, %193 : vector<8x128xf32>
    %197 = arith.addf %195, %196 : vector<8x128xf32>
    %198 = math.tanh %197 : vector<8x128xf32>
    %199 = arith.mulf %194, %198 : vector<8x128xf32>
    %c0_88 = arith.constant 0 : index
    %c0_89 = arith.constant 0 : index
    %200 = vector.load %arg5[%c0_88, %c0_89] : memref<128x128xf32, #tpu.memory_space<vmem>>, vector<128x128xf32>
    %cst_90 = arith.constant dense<0.000000e+00> : vector<8x128xf32>
    %201 = tpu.matmul %199, %200, %cst_90 {dimension_numbers = #tpu.dot_dimension_numbers<[1], [0], [0], [1], [0, 0, 1, 1], [], []>} : vector<8x128xf32>, vector<128x128xf32>, vector<8x128xf32> -> vector<8x128xf32>
    %c0_91 = arith.constant 0 : index
    %c0_92 = arith.constant 0 : index
    %202 = vector.load %arg7[%c0_91, %c0_92] : memref<1x128xf32, #tpu.memory_space<vmem>>, vector<1x128xf32>
    %203 = vector.broadcast %202 : vector<1x128xf32> to vector<8x128xf32>
    %204 = arith.addf %201, %203 : vector<8x128xf32>
    %c0_93 = arith.constant 0 : index
    %c0_94 = arith.constant 0 : index
    %205 = vector.load %arg6[%c0_93, %c0_94] : memref<128x128xf32, #tpu.memory_space<vmem>>, vector<128x128xf32>
    %cst_95 = arith.constant dense<0.000000e+00> : vector<8x128xf32>
    %206 = tpu.matmul %180, %205, %cst_95 {dimension_numbers = #tpu.dot_dimension_numbers<[1], [0], [0], [1], [0, 0, 1, 1], [], []>} : vector<8x128xf32>, vector<128x128xf32>, vector<8x128xf32> -> vector<8x128xf32>
    %207 = arith.addf %204, %206 : vector<8x128xf32>
    %208 = math.tanh %207 : vector<8x128xf32>
    %209 = arith.negf %207 : vector<8x128xf32>
    %210 = math.exp %209 : vector<8x128xf32>
    %cst_96 = arith.constant 1.000000e+00 : f32
    %211 = vector.broadcast %cst_96 : f32 to vector<8x128xf32>
    %212 = arith.addf %211, %210 : vector<8x128xf32>
    %213 = arith.divf %211, %212 : vector<8x128xf32>
    %214 = arith.select %5, %208, %213 : vector<8x128xi1>, vector<8x128xf32>
    %c96_i32_97 = arith.constant 96 : i32
    %215 = tpu.dynamic_rotate %214 by %c96_i32_97 dim 1 : vector<8x128xf32>, i32 -> vector<8x128xf32>
    %c64_i32_98 = arith.constant 64 : i32
    %216 = tpu.dynamic_rotate %214 by %c64_i32_98 dim 1 : vector<8x128xf32>, i32 -> vector<8x128xf32>
    %c32_i32_99 = arith.constant 32 : i32
    %217 = tpu.dynamic_rotate %214 by %c32_i32_99 dim 1 : vector<8x128xf32>, i32 -> vector<8x128xf32>
    %218 = arith.mulf %215, %178 : vector<8x128xf32>
    %219 = arith.mulf %214, %216 : vector<8x128xf32>
    %220 = arith.addf %218, %219 : vector<8x128xf32>
    %221 = math.tanh %220 : vector<8x128xf32>
    %222 = arith.mulf %217, %221 : vector<8x128xf32>
    %223 = vector.extract_strided_slice %11 {offsets = [40, 0], sizes = [8, 128], strides = [1, 1]} : vector<64x128xf32> to vector<8x128xf32>
    %c0_100 = arith.constant 0 : index
    %c0_101 = arith.constant 0 : index
    %224 = vector.load %arg3[%c0_100, %c0_101] : memref<128x128xf32, #tpu.memory_space<vmem>>, vector<128x128xf32>
    %cst_102 = arith.constant dense<0.000000e+00> : vector<8x128xf32>
    %225 = tpu.matmul %199, %224, %cst_102 {dimension_numbers = #tpu.dot_dimension_numbers<[1], [0], [0], [1], [0, 0, 1, 1], [], []>} : vector<8x128xf32>, vector<128x128xf32>, vector<8x128xf32> -> vector<8x128xf32>
    %226 = arith.addf %223, %225 : vector<8x128xf32>
    %227 = math.tanh %226 : vector<8x128xf32>
    %228 = arith.negf %226 : vector<8x128xf32>
    %229 = math.exp %228 : vector<8x128xf32>
    %cst_103 = arith.constant 1.000000e+00 : f32
    %230 = vector.broadcast %cst_103 : f32 to vector<8x128xf32>
    %231 = arith.addf %230, %229 : vector<8x128xf32>
    %232 = arith.divf %230, %231 : vector<8x128xf32>
    %233 = arith.select %5, %227, %232 : vector<8x128xi1>, vector<8x128xf32>
    %c96_i32_104 = arith.constant 96 : i32
    %234 = tpu.dynamic_rotate %233 by %c96_i32_104 dim 1 : vector<8x128xf32>, i32 -> vector<8x128xf32>
    %c64_i32_105 = arith.constant 64 : i32
    %235 = tpu.dynamic_rotate %233 by %c64_i32_105 dim 1 : vector<8x128xf32>, i32 -> vector<8x128xf32>
    %c32_i32_106 = arith.constant 32 : i32
    %236 = tpu.dynamic_rotate %233 by %c32_i32_106 dim 1 : vector<8x128xf32>, i32 -> vector<8x128xf32>
    %237 = arith.mulf %234, %197 : vector<8x128xf32>
    %238 = arith.mulf %233, %235 : vector<8x128xf32>
    %239 = arith.addf %237, %238 : vector<8x128xf32>
    %240 = math.tanh %239 : vector<8x128xf32>
    %241 = arith.mulf %236, %240 : vector<8x128xf32>
    %c0_107 = arith.constant 0 : index
    %c0_108 = arith.constant 0 : index
    %242 = vector.load %arg5[%c0_107, %c0_108] : memref<128x128xf32, #tpu.memory_space<vmem>>, vector<128x128xf32>
    %cst_109 = arith.constant dense<0.000000e+00> : vector<8x128xf32>
    %243 = tpu.matmul %241, %242, %cst_109 {dimension_numbers = #tpu.dot_dimension_numbers<[1], [0], [0], [1], [0, 0, 1, 1], [], []>} : vector<8x128xf32>, vector<128x128xf32>, vector<8x128xf32> -> vector<8x128xf32>
    %c0_110 = arith.constant 0 : index
    %c0_111 = arith.constant 0 : index
    %244 = vector.load %arg7[%c0_110, %c0_111] : memref<1x128xf32, #tpu.memory_space<vmem>>, vector<1x128xf32>
    %245 = vector.broadcast %244 : vector<1x128xf32> to vector<8x128xf32>
    %246 = arith.addf %243, %245 : vector<8x128xf32>
    %c0_112 = arith.constant 0 : index
    %c0_113 = arith.constant 0 : index
    %247 = vector.load %arg6[%c0_112, %c0_113] : memref<128x128xf32, #tpu.memory_space<vmem>>, vector<128x128xf32>
    %cst_114 = arith.constant dense<0.000000e+00> : vector<8x128xf32>
    %248 = tpu.matmul %222, %247, %cst_114 {dimension_numbers = #tpu.dot_dimension_numbers<[1], [0], [0], [1], [0, 0, 1, 1], [], []>} : vector<8x128xf32>, vector<128x128xf32>, vector<8x128xf32> -> vector<8x128xf32>
    %249 = arith.addf %246, %248 : vector<8x128xf32>
    %250 = math.tanh %249 : vector<8x128xf32>
    %251 = arith.negf %249 : vector<8x128xf32>
    %252 = math.exp %251 : vector<8x128xf32>
    %cst_115 = arith.constant 1.000000e+00 : f32
    %253 = vector.broadcast %cst_115 : f32 to vector<8x128xf32>
    %254 = arith.addf %253, %252 : vector<8x128xf32>
    %255 = arith.divf %253, %254 : vector<8x128xf32>
    %256 = arith.select %5, %250, %255 : vector<8x128xi1>, vector<8x128xf32>
    %c96_i32_116 = arith.constant 96 : i32
    %257 = tpu.dynamic_rotate %256 by %c96_i32_116 dim 1 : vector<8x128xf32>, i32 -> vector<8x128xf32>
    %c64_i32_117 = arith.constant 64 : i32
    %258 = tpu.dynamic_rotate %256 by %c64_i32_117 dim 1 : vector<8x128xf32>, i32 -> vector<8x128xf32>
    %c32_i32_118 = arith.constant 32 : i32
    %259 = tpu.dynamic_rotate %256 by %c32_i32_118 dim 1 : vector<8x128xf32>, i32 -> vector<8x128xf32>
    %260 = arith.mulf %257, %220 : vector<8x128xf32>
    %261 = arith.mulf %256, %258 : vector<8x128xf32>
    %262 = arith.addf %260, %261 : vector<8x128xf32>
    %263 = math.tanh %262 : vector<8x128xf32>
    %264 = arith.mulf %259, %263 : vector<8x128xf32>
    %265 = vector.extract_strided_slice %11 {offsets = [48, 0], sizes = [8, 128], strides = [1, 1]} : vector<64x128xf32> to vector<8x128xf32>
    %c0_119 = arith.constant 0 : index
    %c0_120 = arith.constant 0 : index
    %266 = vector.load %arg3[%c0_119, %c0_120] : memref<128x128xf32, #tpu.memory_space<vmem>>, vector<128x128xf32>
    %cst_121 = arith.constant dense<0.000000e+00> : vector<8x128xf32>
    %267 = tpu.matmul %241, %266, %cst_121 {dimension_numbers = #tpu.dot_dimension_numbers<[1], [0], [0], [1], [0, 0, 1, 1], [], []>} : vector<8x128xf32>, vector<128x128xf32>, vector<8x128xf32> -> vector<8x128xf32>
    %268 = arith.addf %265, %267 : vector<8x128xf32>
    %269 = math.tanh %268 : vector<8x128xf32>
    %270 = arith.negf %268 : vector<8x128xf32>
    %271 = math.exp %270 : vector<8x128xf32>
    %cst_122 = arith.constant 1.000000e+00 : f32
    %272 = vector.broadcast %cst_122 : f32 to vector<8x128xf32>
    %273 = arith.addf %272, %271 : vector<8x128xf32>
    %274 = arith.divf %272, %273 : vector<8x128xf32>
    %275 = arith.select %5, %269, %274 : vector<8x128xi1>, vector<8x128xf32>
    %c96_i32_123 = arith.constant 96 : i32
    %276 = tpu.dynamic_rotate %275 by %c96_i32_123 dim 1 : vector<8x128xf32>, i32 -> vector<8x128xf32>
    %c64_i32_124 = arith.constant 64 : i32
    %277 = tpu.dynamic_rotate %275 by %c64_i32_124 dim 1 : vector<8x128xf32>, i32 -> vector<8x128xf32>
    %c32_i32_125 = arith.constant 32 : i32
    %278 = tpu.dynamic_rotate %275 by %c32_i32_125 dim 1 : vector<8x128xf32>, i32 -> vector<8x128xf32>
    %279 = arith.mulf %276, %239 : vector<8x128xf32>
    %280 = arith.mulf %275, %277 : vector<8x128xf32>
    %281 = arith.addf %279, %280 : vector<8x128xf32>
    %282 = math.tanh %281 : vector<8x128xf32>
    %283 = arith.mulf %278, %282 : vector<8x128xf32>
    %c0_126 = arith.constant 0 : index
    %c0_127 = arith.constant 0 : index
    %284 = vector.load %arg5[%c0_126, %c0_127] : memref<128x128xf32, #tpu.memory_space<vmem>>, vector<128x128xf32>
    %cst_128 = arith.constant dense<0.000000e+00> : vector<8x128xf32>
    %285 = tpu.matmul %283, %284, %cst_128 {dimension_numbers = #tpu.dot_dimension_numbers<[1], [0], [0], [1], [0, 0, 1, 1], [], []>} : vector<8x128xf32>, vector<128x128xf32>, vector<8x128xf32> -> vector<8x128xf32>
    %c0_129 = arith.constant 0 : index
    %c0_130 = arith.constant 0 : index
    %286 = vector.load %arg7[%c0_129, %c0_130] : memref<1x128xf32, #tpu.memory_space<vmem>>, vector<1x128xf32>
    %287 = vector.broadcast %286 : vector<1x128xf32> to vector<8x128xf32>
    %288 = arith.addf %285, %287 : vector<8x128xf32>
    %c0_131 = arith.constant 0 : index
    %c0_132 = arith.constant 0 : index
    %289 = vector.load %arg6[%c0_131, %c0_132] : memref<128x128xf32, #tpu.memory_space<vmem>>, vector<128x128xf32>
    %cst_133 = arith.constant dense<0.000000e+00> : vector<8x128xf32>
    %290 = tpu.matmul %264, %289, %cst_133 {dimension_numbers = #tpu.dot_dimension_numbers<[1], [0], [0], [1], [0, 0, 1, 1], [], []>} : vector<8x128xf32>, vector<128x128xf32>, vector<8x128xf32> -> vector<8x128xf32>
    %291 = arith.addf %288, %290 : vector<8x128xf32>
    %292 = math.tanh %291 : vector<8x128xf32>
    %293 = arith.negf %291 : vector<8x128xf32>
    %294 = math.exp %293 : vector<8x128xf32>
    %cst_134 = arith.constant 1.000000e+00 : f32
    %295 = vector.broadcast %cst_134 : f32 to vector<8x128xf32>
    %296 = arith.addf %295, %294 : vector<8x128xf32>
    %297 = arith.divf %295, %296 : vector<8x128xf32>
    %298 = arith.select %5, %292, %297 : vector<8x128xi1>, vector<8x128xf32>
    %c96_i32_135 = arith.constant 96 : i32
    %299 = tpu.dynamic_rotate %298 by %c96_i32_135 dim 1 : vector<8x128xf32>, i32 -> vector<8x128xf32>
    %c64_i32_136 = arith.constant 64 : i32
    %300 = tpu.dynamic_rotate %298 by %c64_i32_136 dim 1 : vector<8x128xf32>, i32 -> vector<8x128xf32>
    %c32_i32_137 = arith.constant 32 : i32
    %301 = tpu.dynamic_rotate %298 by %c32_i32_137 dim 1 : vector<8x128xf32>, i32 -> vector<8x128xf32>
    %302 = arith.mulf %299, %262 : vector<8x128xf32>
    %303 = arith.mulf %298, %300 : vector<8x128xf32>
    %304 = arith.addf %302, %303 : vector<8x128xf32>
    %305 = math.tanh %304 : vector<8x128xf32>
    %306 = arith.mulf %301, %305 : vector<8x128xf32>
    %307 = vector.extract_strided_slice %11 {offsets = [56, 0], sizes = [8, 128], strides = [1, 1]} : vector<64x128xf32> to vector<8x128xf32>
    %c0_138 = arith.constant 0 : index
    %c0_139 = arith.constant 0 : index
    %308 = vector.load %arg3[%c0_138, %c0_139] : memref<128x128xf32, #tpu.memory_space<vmem>>, vector<128x128xf32>
    %cst_140 = arith.constant dense<0.000000e+00> : vector<8x128xf32>
    %309 = tpu.matmul %283, %308, %cst_140 {dimension_numbers = #tpu.dot_dimension_numbers<[1], [0], [0], [1], [0, 0, 1, 1], [], []>} : vector<8x128xf32>, vector<128x128xf32>, vector<8x128xf32> -> vector<8x128xf32>
    %310 = arith.addf %307, %309 : vector<8x128xf32>
    %311 = math.tanh %310 : vector<8x128xf32>
    %312 = arith.negf %310 : vector<8x128xf32>
    %313 = math.exp %312 : vector<8x128xf32>
    %cst_141 = arith.constant 1.000000e+00 : f32
    %314 = vector.broadcast %cst_141 : f32 to vector<8x128xf32>
    %315 = arith.addf %314, %313 : vector<8x128xf32>
    %316 = arith.divf %314, %315 : vector<8x128xf32>
    %317 = arith.select %5, %311, %316 : vector<8x128xi1>, vector<8x128xf32>
    %c96_i32_142 = arith.constant 96 : i32
    %318 = tpu.dynamic_rotate %317 by %c96_i32_142 dim 1 : vector<8x128xf32>, i32 -> vector<8x128xf32>
    %c64_i32_143 = arith.constant 64 : i32
    %319 = tpu.dynamic_rotate %317 by %c64_i32_143 dim 1 : vector<8x128xf32>, i32 -> vector<8x128xf32>
    %c32_i32_144 = arith.constant 32 : i32
    %320 = tpu.dynamic_rotate %317 by %c32_i32_144 dim 1 : vector<8x128xf32>, i32 -> vector<8x128xf32>
    %321 = arith.mulf %318, %281 : vector<8x128xf32>
    %322 = arith.mulf %317, %319 : vector<8x128xf32>
    %323 = arith.addf %321, %322 : vector<8x128xf32>
    %324 = math.tanh %323 : vector<8x128xf32>
    %325 = arith.mulf %320, %324 : vector<8x128xf32>
    %c0_145 = arith.constant 0 : index
    %c0_146 = arith.constant 0 : index
    %326 = vector.load %arg5[%c0_145, %c0_146] : memref<128x128xf32, #tpu.memory_space<vmem>>, vector<128x128xf32>
    %cst_147 = arith.constant dense<0.000000e+00> : vector<8x128xf32>
    %327 = tpu.matmul %325, %326, %cst_147 {dimension_numbers = #tpu.dot_dimension_numbers<[1], [0], [0], [1], [0, 0, 1, 1], [], []>} : vector<8x128xf32>, vector<128x128xf32>, vector<8x128xf32> -> vector<8x128xf32>
    %c0_148 = arith.constant 0 : index
    %c0_149 = arith.constant 0 : index
    %328 = vector.load %arg7[%c0_148, %c0_149] : memref<1x128xf32, #tpu.memory_space<vmem>>, vector<1x128xf32>
    %329 = vector.broadcast %328 : vector<1x128xf32> to vector<8x128xf32>
    %330 = arith.addf %327, %329 : vector<8x128xf32>
    %c0_150 = arith.constant 0 : index
    %c0_151 = arith.constant 0 : index
    %331 = vector.load %arg6[%c0_150, %c0_151] : memref<128x128xf32, #tpu.memory_space<vmem>>, vector<128x128xf32>
    %cst_152 = arith.constant dense<0.000000e+00> : vector<8x128xf32>
    %332 = tpu.matmul %306, %331, %cst_152 {dimension_numbers = #tpu.dot_dimension_numbers<[1], [0], [0], [1], [0, 0, 1, 1], [], []>} : vector<8x128xf32>, vector<128x128xf32>, vector<8x128xf32> -> vector<8x128xf32>
    %333 = arith.addf %330, %332 : vector<8x128xf32>
    %334 = math.tanh %333 : vector<8x128xf32>
    %335 = arith.negf %333 : vector<8x128xf32>
    %336 = math.exp %335 : vector<8x128xf32>
    %cst_153 = arith.constant 1.000000e+00 : f32
    %337 = vector.broadcast %cst_153 : f32 to vector<8x128xf32>
    %338 = arith.addf %337, %336 : vector<8x128xf32>
    %339 = arith.divf %337, %338 : vector<8x128xf32>
    %340 = arith.select %5, %334, %339 : vector<8x128xi1>, vector<8x128xf32>
    %c96_i32_154 = arith.constant 96 : i32
    %341 = tpu.dynamic_rotate %340 by %c96_i32_154 dim 1 : vector<8x128xf32>, i32 -> vector<8x128xf32>
    %c64_i32_155 = arith.constant 64 : i32
    %342 = tpu.dynamic_rotate %340 by %c64_i32_155 dim 1 : vector<8x128xf32>, i32 -> vector<8x128xf32>
    %c32_i32_156 = arith.constant 32 : i32
    %343 = tpu.dynamic_rotate %340 by %c32_i32_156 dim 1 : vector<8x128xf32>, i32 -> vector<8x128xf32>
    %344 = arith.mulf %341, %304 : vector<8x128xf32>
    %345 = arith.mulf %340, %342 : vector<8x128xf32>
    %346 = arith.addf %344, %345 : vector<8x128xf32>
    %347 = math.tanh %346 : vector<8x128xf32>
    %348 = arith.mulf %343, %347 : vector<8x128xf32>
    %c0_157 = arith.constant 0 : index
    %c0_158 = arith.constant 0 : index
    %349 = vector.load %arg8[%c0_157, %c0_158] : memref<128x128xf32, #tpu.memory_space<vmem>>, vector<128x128xf32>
    %cst_159 = arith.constant dense<0.000000e+00> : vector<8x128xf32>
    %350 = tpu.matmul %348, %349, %cst_159 {dimension_numbers = #tpu.dot_dimension_numbers<[1], [0], [0], [1], [0, 0, 1, 1], [], []>} : vector<8x128xf32>, vector<128x128xf32>, vector<8x128xf32> -> vector<8x128xf32>
    %c0_160 = arith.constant 0 : index
    %c0_161 = arith.constant 0 : index
    %351 = vector.load %arg9[%c0_160, %c0_161] : memref<1x128xf32, #tpu.memory_space<vmem>>, vector<1x128xf32>
    %352 = vector.broadcast %351 : vector<1x128xf32> to vector<8x128xf32>
    %353 = arith.addf %350, %352 : vector<8x128xf32>
    %c0_162 = arith.constant 0 : index
    %c0_163 = arith.constant 0 : index
    %354 = vector.load %arg10[%c0_162, %c0_163] : memref<8x128xf32, #tpu.memory_space<vmem>>, vector<8x128xf32>
    tpu.vector_store %arg10[%c0_162, %c0_163], %353 {strides = array<i32>} : memref<8x128xf32, #tpu.memory_space<vmem>>, vector<8x128xf32>,
    return
  }
  func.func @transform_0(%arg0: i32) -> (i32, i32) {
    %c0_i32 = arith.constant 0 : i32
    %c0_i32_0 = arith.constant 0 : i32
    %c0_i32_1 = arith.constant 0 : i32
    return %c0_i32, %c0_i32_0 : i32, i32
  }
  func.func @transform_1(%arg0: i32) -> (i32, i32) {
    %c0_i32 = arith.constant 0 : i32
    %c0_i32_0 = arith.constant 0 : i32
    %c0_i32_1 = arith.constant 0 : i32
    return %c0_i32, %c0_i32_0 : i32, i32
  }
  func.func @transform_2(%arg0: i32) -> (i32, i32) {
    %c0_i32 = arith.constant 0 : i32
    %c0_i32_0 = arith.constant 0 : i32
    %c0_i32_1 = arith.constant 0 : i32
    return %c0_i32, %c0_i32_0 : i32, i32
  }
  func.func @transform_3(%arg0: i32) -> (i32, i32) {
    %c0_i32 = arith.constant 0 : i32
    %c0_i32_0 = arith.constant 0 : i32
    %c0_i32_1 = arith.constant 0 : i32
    return %c0_i32, %c0_i32_0 : i32, i32
  }
  func.func @transform_4(%arg0: i32) -> (i32, i32) {
    %c0_i32 = arith.constant 0 : i32
    %c0_i32_0 = arith.constant 0 : i32
    %c0_i32_1 = arith.constant 0 : i32
    return %c0_i32, %c0_i32_0 : i32, i32
  }
  func.func @transform_5(%arg0: i32) -> (i32, i32) {
    %c0_i32 = arith.constant 0 : i32
    %c0_i32_0 = arith.constant 0 : i32
    %c0_i32_1 = arith.constant 0 : i32
    return %c0_i32, %c0_i32_0 : i32, i32
  }
  func.func @transform_6(%arg0: i32) -> (i32, i32) {
    %c0_i32 = arith.constant 0 : i32
    %c0_i32_0 = arith.constant 0 : i32
    %c0_i32_1 = arith.constant 0 : i32
    return %c0_i32, %c0_i32_0 : i32, i32
  }
  func.func @transform_7(%arg0: i32) -> (i32, i32) {
    %c0_i32 = arith.constant 0 : i32
    %c0_i32_0 = arith.constant 0 : i32
    %c0_i32_1 = arith.constant 0 : i32
    return %c0_i32, %c0_i32_0 : i32, i32
  }
  func.func @transform_8(%arg0: i32) -> (i32, i32) {
    %c0_i32 = arith.constant 0 : i32
    %c0_i32_0 = arith.constant 0 : i32
    %c0_i32_1 = arith.constant 0 : i32
    return %c0_i32, %c0_i32_0 : i32, i32
  }
  func.func @transform_9(%arg0: i32) -> (i32, i32) {
    %c0_i32 = arith.constant 0 : i32
    %c0_i32_0 = arith.constant 0 : i32
    %c0_i32_1 = arith.constant 0 : i32
    return %c0_i32, %c0_i32_0 : i32, i32
  }
}

</mosaic_0001>

<bundles_post_ra>
// kernel: lstm_model_forward.1
= control target key start
LH: loop header
LB: loop body
LE: loop exit
PB: predicated region body
PF: predicated region fallthrough
CT: control target
= control target key end

     0   :  { %14 = vsyncpa [#allocation3], 0  ;;  %s5460_s0 = inlined_call_operand.vmem [shape: f32[64,4], index: 0, kind: input, shape index: {}]   ;;  %s5461_s1 = inlined_call_operand.vmem [shape: f32[4,128], index: 1, kind: input, shape index: {}]   ;;  %s5462_s2 = inlined_call_operand.vmem [shape: f32[128,128], index: 2, kind: input, shape index: {}]   ;;  %s5463_s3 = inlined_call_operand.vmem [shape: f32[1,128], index: 3, kind: input, shape index: {}]   ;;  %s5464_s4 = inlined_call_operand.hbm [shape: f32[128,128], index: 4, kind: input, shape index: {}]   ;;  %s5465_s5 = inlined_call_operand.hbm [shape: f32[128,128], index: 5, kind: input, shape index: {}]   ;;  %s5466_s6 = inlined_call_operand.vmem [shape: f32[1,128], index: 6, kind: input, shape index: {}]   ;;  %s5467_s7 = inlined_call_operand.hbm [shape: f32[128,128], index: 7, kind: input, shape index: {}]   ;;  %s5468_s8 = inlined_call_operand.vmem [shape: f32[1,128], index: 8, kind: input, shape index: {}]   ;;  %s5469_s9 = inlined_call_operand.vmem [shape: f32[8,128], index: 9, kind: output, shape index: {}]  }
   0x1   :  { %15 = vsyncpa [#allocation5], 0  ;;  %s4569_s30 = smov [#allocation4]   ;;  %s4570_s11 = smov [#allocation2]  }
   0x2   :  { %s41_s10 = sshll.u32 %s4569_s30, 4  ;;  %s29_s12 = sshll.u32 %s4570_s11, 4  ;;  %s42_s10 = int_to_ptr.vmem [resolvable:$true] %s41_s10  ;;  %s4630_s12 = int_to_ptr.vmem [resolvable:$true] %s29_s12 }
   0x3   :  { %s4499_s15 = scalar_lea.hbm %s5465_s5, 2048 }
   0x4   :  { %p4500_p0 = scmp.ne.s32.totalorder %s5465_s5, %s4499_s15  ;;  %p4503_p1 = scmp.lt.u32.totalorder %s4499_s15, %s5465_s5 }
   0x6   :  { %p4505_p2 = pnand %p4503_p1, %p4500_p0 }
   0x8   :  { %4508 = shalt.err (!%p4505_p2)
}
   0x9   :  { %s4509_s20 = scalar_lea.vmem %s42_s10, 2048  ;;  %p4514_p4 = scmp.lt.s32.totalorder %s42_s10, %s42_s10 }
   0xa   :  { %p4510_p3 = scmp.ne.s32.totalorder %s42_s10, %s4509_s20  ;;  %p4515_p5 = scmp.lt.s32.totalorder %s4509_s20, %s4509_s20 }
   0xc   :  { %p4516_p6 = por %p4515_p5, %p4514_p4 }
   0xe   :  { %p4517_p7 = pnand %p4516_p6, %p4510_p3 }
  0x10   :  { %4520 = shalt.err (!%p4517_p7)
}
  0x11   :  { %s4571_s21 = smov 128   ;;  %s4572_s22 = smov 8  }
  0x12   :  { %47 = dma.hbm_to_vmem [thread:$0]  %s5465_s5, 2048, %s42_s10, [#allocation5], %s4571_s21, %s4571_s21, %s4572_s22  }
  0x13   :  { %s4521_s27 = scalar_lea.hbm %s5464_s4, 2048 }
  0x14   :  { %p4522_p8 = scmp.ne.s32.totalorder %s5464_s4, %s4521_s27  ;;  %p4525_p9 = scmp.lt.u32.totalorder %s4521_s27, %s5464_s4 }
  0x16   :  { %p4527_p10 = pnand %p4525_p9, %p4522_p8 }
  0x18   :  { %4530 = shalt.err (!%p4527_p10)
}
  0x19   :  { %s4531_s13 = scalar_lea.vmem %s4630_s12, 2048  ;;  %p4536_p12 = scmp.lt.s32.totalorder %s4630_s12, %s4630_s12 }
  0x1a   :  { %p4532_p11 = scmp.ne.s32.totalorder %s4630_s12, %s4531_s13  ;;  %p4537_p13 = scmp.lt.s32.totalorder %s4531_s13, %s4531_s13 }
  0x1c   :  { %p4538_p0 = por %p4537_p13, %p4536_p12 }
  0x1e   :  { %p4539_p1 = pnand %p4538_p0, %p4532_p11 }
  0x20   :  { %4542 = shalt.err (!%p4539_p1)
}
  0x21   :  { %35 = dma.hbm_to_vmem [thread:$0]  %s5464_s4, 2048, %s4630_s12, [#allocation3], %s4571_s21, %s4571_s21, %s4572_s22  }
  0x22   :  { %s4573_s14 = smov [#allocation6]   ;;  %s4543_s18 = scalar_lea.hbm %s5467_s7, 2048 }
  0x23   :  { %s55_s15 = sshll.u32 %s4573_s14, 4  ;;  %p4544_p2 = scmp.ne.s32.totalorder %s5467_s7, %s4543_s18  ;;  %s56_s15 = int_to_ptr.vmem [resolvable:$true] %s55_s15 }
  0x24   :  { %p4547_p3 = scmp.lt.u32.totalorder %s4543_s18, %s5467_s7 }
  0x26   :  { %p4549_p4 = pnand %p4547_p3, %p4544_p2 }
  0x28   :  { %4552 = shalt.err (!%p4549_p4)
}
  0x29   :  { %s4553_s25 = scalar_lea.vmem %s56_s15, 2048  ;;  %p4558_p6 = scmp.lt.s32.totalorder %s56_s15, %s56_s15 }
  0x2a   :  { %p4554_p5 = scmp.ne.s32.totalorder %s56_s15, %s4553_s25  ;;  %p4559_p7 = scmp.lt.s32.totalorder %s4553_s25, %s4553_s25 }
  0x2c   :  { %p4560_p8 = por %p4559_p7, %p4558_p6 }
  0x2e   :  { %p4561_p9 = pnand %p4560_p8, %p4554_p5 }
  0x30   :  { %4564 = shalt.err (!%p4561_p9)
}
  0x31   :  { %61 = dma.hbm_to_vmem [thread:$0]  %s5467_s7, 2048, %s56_s15, [#allocation5], %s4571_s21, %s4571_s21, %s4572_s22  }
  0x32   :  { %4565 = dma.done.wait [#allocation3], 2048  }
  0x33   :  { %4566 = vsyncadd [#allocation3], 4294965248 }
  0x34   :  { %4567 = dma.done.wait [#allocation5], 4096  }
  0x35   :  { %4568 = vsyncadd [#allocation5], 4294963200  ;;  %v4574_v0 = vmov 0.0|0.0   ;;  %vm4575_vm0 = vmmov 0   ;;  %v4576_v1 = vmov 0.0   ;;  %v228_v2 = vld [vmem:[%s5462_s2] sm:$0xff]  ;;  %v73_v47 = vlaneseq }
  0x36   :  { %3734 = vmatprep.subr.bf16.mxu1 %v4574_v0  ;;  %2891 = vmatprep.mubr.msk.f32.mxu1 %vm4575_vm0, %v4576_v1  ;;  %v229_v3 = vld [vmem:[%s5462_s2 + $0x8] sm:$0xff]  ;;  %v230_v4 = vld [vmem:[%s5462_s2 + $0x10] sm:$0xff]  ;;  %v231_v6 = vld [vmem:[%s5462_s2 + $0x18] sm:$0xff]  ;;  %vm119_vm1 = vcmask 1043456   ;;  %vm94_vm2 = vcmask 31744   ;;  %s4577_s12 = smov 32  }
  0x37   :  { %v4694_v5 = vpack.c.bf16 %v229_v3, %v228_v2  ;;  %v4700_v7 = vpack.c.bf16 %v231_v6, %v230_v4  ;;  %v232_v8 = vld [vmem:[%s5462_s2 + $0x20] sm:$0xff]  ;;  %v233_v9 = vld [vmem:[%s5462_s2 + $0x28] sm:$0xff]  ;;  %v234_v14 = vld [vmem:[%s5462_s2 + $0x30] sm:$0xff]  ;;  %v74_v52 = vand.u32 127, %v73_v47  ;;  %s4578_s26 = smov 96   ;;  %s4579_s29 = smov 64  }
  0x38   :  { %v86_v10 = vld [vmem:[%s5461_s1] sm:$0xf]  ;;  %v79_v12 = vld [vmem:[%s5460_s0 + $0x8] sm:$0xff]  ;;  %v4720_v13 = vpack.c.bf16 %v233_v9, %v232_v8  ;;  %v235_v15 = vld [vmem:[%s5462_s2 + $0x38] sm:$0xff] }
  0x39   :  { %3736 = vmatpush3.bf16.msra.mxu1 %v4694_v5  ;;  %2845 = vmatprep.subr.msk.mxu0 %vm119_vm1, %v86_v10  ;;  %v78_v11 = vld [vmem:[%s5460_s0] sm:$0xff]  ;;  %v4732_v16 = vpack.c.bf16 %v235_v15, %v234_v14  ;;  %v237_v18 = vld [vmem:[%s5462_s2 + $0x48] sm:$0xff]  ;;  %v238_v20 = vld [vmem:[%s5462_s2 + $0x50] sm:$0xff]  ;;  %vm75_vm3 = vcmp.ge.s32.totalorder %v74_v52, 64  ;;  %vm76_vm4 = vcmp.lt.s32.totalorder %v74_v52, 96 }
  0x3a   :  { %3737 = vmatprep.subr.bf16.mxu1 %v4574_v0  ;;  %2846 = vmatpush3.msk.msra.mxu0 %vm119_vm1, %v86_v10  ;;  %v236_v17 = vld [vmem:[%s5462_s2 + $0x40] sm:$0xff]  ;;  %v239_v21 = vld [vmem:[%s5462_s2 + $0x58] sm:$0xff]  ;;  %v241_v24 = vld [vmem:[%s5462_s2 + $0x68] sm:$0xff] }
  0x3b   :  { %2847 = vmatprep.mubr.msk.f32.mxu0 %vm94_vm2, %v78_v11  ;;  %3758 = vmatprep.subr.bf16.mxu0 %v4574_v0  ;;  %v4742_v19 = vpack.c.bf16 %v237_v18, %v236_v17  ;;  %v4752_v22 = vpack.c.bf16 %v239_v21, %v238_v20  ;;  %v240_v23 = vld [vmem:[%s5462_s2 + $0x60] sm:$0xff]  ;;  %v242_v26 = vld [vmem:[%s5462_s2 + $0x70] sm:$0xff]  ;;  %v243_v27 = vld [vmem:[%s5462_s2 + $0x78] sm:$0xff] }
  0x3c   :  { %2848 = vmatmul.mubr.msk.f32.vlgmr.msra.gmra.mrb[0].mxu0 %vm94_vm2, %v79_v12  ;;  %v4762_v25 = vpack.c.bf16 %v241_v24, %v240_v23  ;;  %v4772_v28 = vpack.c.bf16 %v243_v27, %v242_v26  ;;  %v334_v29 = vld [vmem:[#allocation2] sm:$0xff]  ;;  %v335_v30 = vld [vmem:[#allocation2 + $0x8] sm:$0xff]  ;;  %v336_v31 = vld [vmem:[#allocation2 + $0x10] sm:$0xff] }
  0x3d   :  { %3739 = vmatpush3.bf16.msra.mxu1 %v4700_v7  ;;  %v4796_v32 = vpack.c.bf16 %v335_v30, %v334_v29  ;;  %v337_v33 = vld [vmem:[#allocation2 + $0x18] sm:$0xff]  ;;  %v338_v35 = vld [vmem:[#allocation2 + $0x20] sm:$0xff]  ;;  %v339_v36 = vld [vmem:[#allocation2 + $0x28] sm:$0xff] }
  0x3e   :  { %3740 = vmatprep.subr.bf16.mxu1 %v4574_v0  ;;  %v4799_v34 = vpack.c.bf16 %v337_v33, %v336_v31  ;;  %v4803_v37 = vpack.c.bf16 %v339_v36, %v338_v35  ;;  %v4813_v40 = vld [vmem:[%s5463_s3] ss:$0 sm:$0xff]  ;;  %v340_v48 = vld [vmem:[#allocation2 + $0x30] sm:$0xff]  ;;  %v341_v49 = vld [vmem:[#allocation2 + $0x38] sm:$0xff] }
  0x3f   :  { %3760 = vmatpush3.bf16.msra.mxu0 %v4796_v32  ;;  %v4816_v51 = vpack.c.bf16 %v341_v49, %v340_v48  ;;  %v342_v53 = vld [vmem:[#allocation2 + $0x40] sm:$0xff]  ;;  %v343_v54 = vld [vmem:[#allocation2 + $0x48] sm:$0xff]  ;;  %v80_v56 = vld [vmem:[%s5460_s0 + $0x10] sm:$0xff] }
  0x40   :  { %3761 = vmatprep.subr.bf16.mxu0 %v4574_v0  ;;  %v4820_v55 = vpack.c.bf16 %v343_v54, %v342_v53  ;;  %v344_v57 = vld [vmem:[#allocation2 + $0x50] sm:$0xff]  ;;  %v345_v58 = vld [vmem:[#allocation2 + $0x58] sm:$0xff]  ;;  %2850 = vmatprep.mubr.msk.f32.mxu0 %vm94_vm2, %v80_v56  ;;  %v82_v61 = vld [vmem:[%s5460_s0 + $0x20] sm:$0xff] }
  0x41   :  { %3742 = vmatpush3.bf16.msra.mxu1 %v4720_v13  ;;  %v81_v59 = vld [vmem:[%s5460_s0 + $0x18] sm:$0xff]  ;;  %v4831_v60 = vpack.c.bf16 %v345_v58, %v344_v57  ;;  %v346_v62 = vld [vmem:[#allocation2 + $0x60] sm:$0xff]  ;;  %vm4837_vm5 = vmand %vm75_vm3, %vm76_vm4 }
  0x42   :  { %3743 = vmatprep.subr.bf16.mxu1 %v4574_v0  ;;  %2851 = vmatmul.mubr.msk.f32.gmra.mrb[2].mxu0 %vm94_vm2, %v81_v59  ;;  %v83_v2 = vld [vmem:[%s5460_s0 + $0x28] sm:$0xff]  ;;  %v84_v9 = vld [vmem:[%s5460_s0 + $0x30] sm:$0xff]  ;;  %v349_v11 = vld [vmem:[#allocation2 + $0x78] sm:$0xff] }
  0x43   :  { %3763 = vmatpush3.bf16.msra.mxu0 %v4799_v34  ;;  %2853 = vmatprep.mubr.msk.f32.mxu0 %vm94_vm2, %v82_v61  ;;  %v347_v3 = vld [vmem:[#allocation2 + $0x68] sm:$0xff]  ;;  %v348_v10 = vld [vmem:[#allocation2 + $0x70] sm:$0xff]  ;;  %v85_v14 = vld [vmem:[%s5460_s0 + $0x38] sm:$0xff] }
  0x44   :  { %3764 = vmatprep.subr.bf16.mxu0 %v4574_v0  ;;  %v4847_v6 = vpack.c.bf16 %v347_v3, %v346_v62  ;;  %v4862_v15 = vpack.c.bf16 %v349_v11, %v348_v10  ;;  %v427_v24 = vld [vmem:[#allocation4] sm:$0xff]  ;;  %v428_v26 = vld [vmem:[#allocation4 + $0x8] sm:$0xff]  ;;  %v429_v33 = vld [vmem:[#allocation4 + $0x10] sm:$0xff] }
  0x45   :  { %3745 = vmatpush3.bf16.msra.mxu1 %v4732_v16  ;;  %v4874_v30 = vpack.c.bf16 %v428_v26, %v427_v24  ;;  %v430_v35 = vld [vmem:[#allocation4 + $0x18] sm:$0xff]  ;;  %v436_v47 = vld [vmem:[#allocation4 + $0x48] sm:$0xff]  ;;  %v437_v49 = vld [vmem:[#allocation4 + $0x50] sm:$0xff] }
  0x46   :  { %3746 = vmatprep.subr.bf16.mxu1 %v4574_v0  ;;  %2854 = vmatmul.mubr.msk.f32.gmra.mrb[4].mxu0 %vm94_vm2, %v83_v2  ;;  %v4877_v36 = vpack.c.bf16 %v430_v35, %v429_v33  ;;  %v439_v53 = vld [vmem:[#allocation4 + $0x60] sm:$0xff]  ;;  %v440_v54 = vld [vmem:[#allocation4 + $0x68] sm:$0xff]  ;;  %v441_v57 = vld [vmem:[#allocation4 + $0x70] sm:$0xff] }
  0x47   :  { %3766 = vmatpush3.bf16.msra.mxu0 %v4803_v37  ;;  %2856 = vmatprep.mubr.msk.f32.mxu0 %vm94_vm2, %v84_v9  ;;  %v4911_v56 = vpack.c.bf16 %v440_v54, %v439_v53  ;;  %v442_v58 = vld [vmem:[#allocation4 + $0x78] sm:$0xff]  ;;  %v2410_v63 = vld [vmem:[%s5468_s8] ss:$0 sm:$0xff] }
  0x48   :  { %3767 = vmatprep.subr.bf16.mxu0 %v4574_v0  ;;  %v4917_v59 = vpack.c.bf16 %v442_v58, %v441_v57 }
  0x49   :  { %3748 = vmatpush3.bf16.msra.mxu1 %v4742_v19 }
  0x4a   :  { %3749 = vmatprep.subr.bf16.mxu1 %v4574_v0  ;;  %2857 = vmatmul.mubr.msk.f32.gmra.mrb[6].mxu0 %vm94_vm2, %v85_v14 }
  0x4b   :  { %3769 = vmatpush3.bf16.msra.mxu0 %v4816_v51  ;;  %2926 = vmatprep.mubr.msk.f32.mxu0 %vm4575_vm0, %v4576_v1 }
  0x4c   :  { %3770 = vmatprep.subr.bf16.mxu0 %v4574_v0 }
  0x4d   :  { %3751 = vmatpush3.bf16.msra.mxu1 %v4752_v22 }
  0x4e   :  { %3752 = vmatprep.subr.bf16.mxu1 %v4574_v0 }
  0x4f   :  { %3772 = vmatpush3.bf16.msra.mxu0 %v4820_v55 }
  0x50   :  { %3773 = vmatprep.subr.bf16.mxu0 %v4574_v0 }
  0x51   :  { %3754 = vmatpush3.bf16.msra.mxu1 %v4762_v25 }
  0x52   :  { %3755 = vmatprep.subr.bf16.mxu1 %v4574_v0 }
  0x53   :  { %3775 = vmatpush3.bf16.msra.mxu0 %v4831_v60 }
  0x54   :  { %3776 = vmatprep.subr.bf16.mxu0 %v4574_v0 }
  0x55   :  { %3757 = vmatpush3.bf16.msra.mxu1 %v4772_v28 }
  0x56   :  { %3806 = vmatprep.subr.bf16.mxu1 %v4574_v0 }
  0x57   :  { %3778 = vmatpush3.bf16.msra.mxu0 %v4847_v6 }
  0x58   :  { %2892 = vmatmul.mubr.f32.vlgmr.msra.gmra.mrb[0].mxu1 %v4576_v1  ;;  %3779 = vmatprep.subr.bf16.mxu0 %v4574_v0 }
  0x59   :  { %3808 = vmatpush3.bf16.msra.mxu1 %v4694_v5  ;;  %2996 = vmatprep.mubr.msk.f32.mxu1 %vm4575_vm0, %v4576_v1 }
  0x5a   :  { %3809 = vmatprep.subr.bf16.mxu1 %v4574_v0 }
  0x5b   :  { %3781 = vmatpush3.bf16.msra.mxu0 %v4862_v15 }
  0x5c   :  { %3782 = vmatprep.subr.bf16.mxu0 %v4574_v0 }
  0x5d   :  { %3811 = vmatpush3.bf16.msra.mxu1 %v4700_v7 }
  0x5e   :  { %3812 = vmatprep.subr.bf16.mxu1 %v4574_v0 }
  0x61   :  { %3814 = vmatpush3.bf16.msra.mxu1 %v4720_v13 }
  0x62   :  { %3815 = vmatprep.subr.bf16.mxu1 %v4574_v0 }
  0x65   :  { %3817 = vmatpush3.bf16.msra.mxu1 %v4732_v16 }
  0x66   :  { %3818 = vmatprep.subr.bf16.mxu1 %v4574_v0 }
  0x69   :  { %3820 = vmatpush3.bf16.msra.mxu1 %v4742_v19 }
  0x6a   :  { %3821 = vmatprep.subr.bf16.mxu1 %v4574_v0 }
  0x6d   :  { %3823 = vmatpush3.bf16.msra.mxu1 %v4752_v22 }
  0x6e   :  { %3824 = vmatprep.subr.bf16.mxu1 %v4574_v0 }
  0x71   :  { %3826 = vmatpush3.bf16.msra.mxu1 %v4762_v25 }
  0x72   :  { %3827 = vmatprep.subr.bf16.mxu1 %v4574_v0 }
  0x75   :  { %3829 = vmatpush3.bf16.msra.mxu1 %v4772_v28 }
  0x76   :  { %3830 = vmatprep.subr.bf16.mxu1 %v4574_v0 }
 0x10f   :  { %v4808_v38 = vpop.f32.mrb[0].mxu0 }
 0x110   :  { %v189_v39 = vpop.f32.mrb[1].mxu0  ;;  %v195_v9 = vadd.f32 %v4808_v38, %v4813_v40  ;;  %v4966_v38 = vld [vmem:[%s5466_s6] ss:$0 sm:$0xff] }
 0x111   :  { %v190_v41 = vadd.f32 %v4813_v40, %v189_v39  ;;  %v431_v39 = vld [vmem:[#allocation4 + $0x20] sm:$0xff] }
 0x115   :  { %v4945_v61 = vpop.f32.mrb[2].mxu0 }
 0x116   :  { %v4947_v62 = vpop.f32.mrb[3].mxu0 }
 0x119   :  { %v4949_v2 = vpop.f32.mrb[4].mxu0 }
 0x11a   :  { %v4951_v3 = vpop.f32.mrb[5].mxu0 }
 0x12b   :  { %v310_v42 = vpop.f32.mrb[0].mxu1 }
 0x12c   :  { %v314_v43 = vadd.f32 %v310_v42, %v190_v41  ;;  %v2893_v44 = vpop.f32.mrb[1].mxu1  ;;  %v432_v41 = vld [vmem:[#allocation4 + $0x28] sm:$0xff] }
 0x12d   :  { %v4887_v42 = vpack.c.bf16 %v432_v41, %v431_v39  ;;  %v434_v44 = vld [vmem:[#allocation4 + $0x38] sm:$0xff] }
 0x12e   :  { %v2393_v45 = vmul.f32 -1.442695, %v314_v43 }
 0x130   :  { %4369 = vpow2.f32 %v2393_v45 }
 0x131   :  { %4371 = vtanh.f32 %v314_v43  ;;  %v433_v43 = vld [vmem:[#allocation4 + $0x30] sm:$0xff] }
 0x132   :  { %v4893_v45 = vpack.c.bf16 %v434_v44, %v433_v43 }
 0x13a   :  { %v4370_v46 = vpop.eup %4369 }
 0x13b   :  { %v319_v50 = vadd.f32 1.0, %v4370_v46  ;;  %v4372_v4 = vpop.eup %4371  ;;  %v435_v46 = vld [vmem:[#allocation4 + $0x40] sm:$0xff] }
 0x13c   :  { %v4899_v48 = vpack.c.bf16 %v436_v47, %v435_v46 }
 0x13d   :  { %4373 = vrcp.f32 %v319_v50  ;;  %v438_v50 = vld [vmem:[#allocation4 + $0x58] sm:$0xff] }
 0x13e   :  { %v4905_v52 = vpack.c.bf16 %v438_v50, %v437_v49 }
 0x147   :  { %v4374_v8 = vpop.eup %4373 }
 0x148   :  { %v322_v12 = vsel %vm4837_vm5, %v4372_v4, %v4374_v8  ;;  %v4953_v4 = vpop.f32.mrb[6].mxu0 }
 0x149   :  { %327 = vrot.lane.b32.xlu1 %v322_v12, %s4577_s12  ;;  %323 = vrot.lane.b32.xlu0 %v322_v12, %s4578_s26  ;;  %v4955_v8 = vpop.f32.mrb[7].mxu0 }
 0x14d   :  { %325 = vrot.lane.b32.xlu0 %v322_v12, %s4579_s29 }
 0x1bb   :  { %v324_v17 = vpop.permute.xlu0 %323  ;;  %v328_v29 = vpop.permute.xlu1 %327 }
 0x1bc   :  { %v329_v20 = vmul.f32 0.0, %v324_v17 }
 0x1bf   :  { %v326_v18 = vpop.permute.xlu0 %325 }
 0x1c0   :  { %v330_v21 = vmul.f32 %v326_v18, %v322_v12 }
 0x1c2   :  { %v4871_v23 = vadd.f32 %v330_v21, %v329_v20 }
 0x1c4   :  { %4375 = vtanh.f32 %v4871_v23 }
 0x1ce   :  { %v4376_v27 = vpop.eup %4375 }
 0x1cf   :  { %v333_v31 = vmul.f32 %v4376_v27, %v328_v29 }
 0x1d1   :  { %2927 = vmatmul.mubr.f32.vlgmr.msra.gmra.mrb[8].mxu0 %v333_v31  ;;  %2997 = vmatmul.mubr.f32.vlgmr.msra.gmra.mrb[2].mxu1 %v333_v31 }
 0x1d2   :  { %3784 = vmatpush3.bf16.msra.mxu0 %v4874_v30  ;;  %2961 = vmatprep.mubr.msk.f32.mxu0 %vm4575_vm0, %v4576_v1 }
 0x1d3   :  { %3785 = vmatprep.subr.bf16.mxu0 %v4574_v0  ;;  %3832 = vmatpush3.bf16.msra.mxu1 %v4796_v32 }
 0x1d4   :  { %3833 = vmatprep.subr.bf16.mxu1 %v4574_v0  ;;  %3031 = vmatprep.mubr.msk.f32.mxu1 %vm4575_vm0, %v4576_v1 }
 0x1d6   :  { %3787 = vmatpush3.bf16.msra.mxu0 %v4877_v36 }
 0x1d7   :  { %3788 = vmatprep.subr.bf16.mxu0 %v4574_v0  ;;  %3835 = vmatpush3.bf16.msra.mxu1 %v4799_v34 }
 0x1d8   :  { %3836 = vmatprep.subr.bf16.mxu1 %v4574_v0 }
 0x1da   :  { %3790 = vmatpush3.bf16.msra.mxu0 %v4887_v42 }
 0x1db   :  { %3791 = vmatprep.subr.bf16.mxu0 %v4574_v0  ;;  %3838 = vmatpush3.bf16.msra.mxu1 %v4803_v37 }
 0x1dc   :  { %3839 = vmatprep.subr.bf16.mxu1 %v4574_v0 }
 0x1de   :  { %3793 = vmatpush3.bf16.msra.mxu0 %v4893_v45 }
 0x1df   :  { %3794 = vmatprep.subr.bf16.mxu0 %v4574_v0  ;;  %3841 = vmatpush3.bf16.msra.mxu1 %v4816_v51 }
 0x1e0   :  { %3842 = vmatprep.subr.bf16.mxu1 %v4574_v0 }
 0x1e2   :  { %3796 = vmatpush3.bf16.msra.mxu0 %v4899_v48 }
 0x1e3   :  { %3797 = vmatprep.subr.bf16.mxu0 %v4574_v0  ;;  %3844 = vmatpush3.bf16.msra.mxu1 %v4820_v55 }
 0x1e4   :  { %3845 = vmatprep.subr.bf16.mxu1 %v4574_v0 }
 0x1e6   :  { %3799 = vmatpush3.bf16.msra.mxu0 %v4905_v52 }
 0x1e7   :  { %3800 = vmatprep.subr.bf16.mxu0 %v4574_v0  ;;  %3847 = vmatpush3.bf16.msra.mxu1 %v4831_v60 }
 0x1e8   :  { %3848 = vmatprep.subr.bf16.mxu1 %v4574_v0 }
 0x1ea   :  { %3802 = vmatpush3.bf16.msra.mxu0 %v4911_v56 }
 0x1eb   :  { %3803 = vmatprep.subr.bf16.mxu0 %v4574_v0  ;;  %3850 = vmatpush3.bf16.msra.mxu1 %v4847_v6 }
 0x1ec   :  { %3851 = vmatprep.subr.bf16.mxu1 %v4574_v0 }
 0x1ee   :  { %3805 = vmatpush3.bf16.msra.mxu0 %v4917_v59 }
 0x1ef   :  { %3878 = vmatprep.subr.bf16.mxu0 %v4574_v0  ;;  %3853 = vmatpush3.bf16.msra.mxu1 %v4862_v15 }
 0x1f0   :  { %3854 = vmatprep.subr.bf16.mxu1 %v4574_v0 }
 0x1f1   :  { %2962 = vmatmul.mubr.f32.vlgmr.msra.gmra.mrb[8].mxu0 %v4576_v1 }
 0x1f2   :  { %3880 = vmatpush3.bf16.msra.mxu0 %v4694_v5  ;;  %3101 = vmatprep.mubr.msk.f32.mxu0 %vm4575_vm0, %v4576_v1 }
 0x1f3   :  { %3881 = vmatprep.subr.bf16.mxu0 %v4574_v0 }
 0x1f6   :  { %3883 = vmatpush3.bf16.msra.mxu0 %v4700_v7 }
 0x1f7   :  { %3884 = vmatprep.subr.bf16.mxu0 %v4574_v0 }
 0x1fa   :  { %3886 = vmatpush3.bf16.msra.mxu0 %v4720_v13 }
 0x1fb   :  { %3887 = vmatprep.subr.bf16.mxu0 %v4574_v0 }
 0x1fe   :  { %3889 = vmatpush3.bf16.msra.mxu0 %v4732_v16 }
 0x1ff   :  { %3890 = vmatprep.subr.bf16.mxu0 %v4574_v0 }
 0x202   :  { %3892 = vmatpush3.bf16.msra.mxu0 %v4742_v19 }
 0x203   :  { %3893 = vmatprep.subr.bf16.mxu0 %v4574_v0 }
 0x206   :  { %3895 = vmatpush3.bf16.msra.mxu0 %v4752_v22 }
 0x207   :  { %3896 = vmatprep.subr.bf16.mxu0 %v4574_v0 }
 0x20a   :  { %3898 = vmatpush3.bf16.msra.mxu0 %v4762_v25 }
 0x20b   :  { %3899 = vmatprep.subr.bf16.mxu0 %v4574_v0 }
 0x20e   :  { %3901 = vmatpush3.bf16.msra.mxu0 %v4772_v28 }
 0x20f   :  { %3902 = vmatprep.subr.bf16.mxu0 %v4574_v0 }
 0x2a4   :  { %v599_v10 = vpop.f32.mrb[2].mxu1 }
 0x2a5   :  { %v603_v11 = vadd.f32 %v599_v10, %v195_v9  ;;  %v2998_v12 = vpop.f32.mrb[3].mxu1 }
 0x2a7   :  { %v2396_v14 = vmul.f32 -1.442695, %v603_v11 }
 0x2a9   :  { %4377 = vpow2.f32 %v2396_v14 }
 0x2aa   :  { %4379 = vtanh.f32 %v603_v11 }
 0x2b3   :  { %v4378_v17 = vpop.eup %4377 }
 0x2b4   :  { %v608_v18 = vadd.f32 1.0, %v4378_v17  ;;  %v4380_v20 = vpop.eup %4379 }
 0x2b6   :  { %4381 = vrcp.f32 %v608_v18  ;;  %v200_v18 = vadd.f32 %v4813_v40, %v4947_v62 }
 0x2c0   :  { %v4382_v21 = vpop.eup %4381 }
 0x2c1   :  { %v611_v24 = vsel %vm4837_vm5, %v4380_v20, %v4382_v21 }
 0x2c2   :  { %614 = vrot.lane.b32.xlu0 %v611_v24, %s4579_s29  ;;  %612 = vrot.lane.b32.xlu1 %v611_v24, %s4578_s26 }
 0x2c4   :  { %v509_v26 = vpop.f32.mrb[8].mxu0 }
 0x2c5   :  { %v4334_v27 = vadd.f32 %v4966_v38, %v509_v26  ;;  %v2963_v29 = vpop.f32.mrb[9].mxu0 }
 0x2c6   :  { %616 = vrot.lane.b32.xlu1 %v611_v24, %s4577_s12 }
 0x2c7   :  { %v2395_v31 = vmul.f32 -1.442695, %v4334_v27 }
 0x2c9   :  { %4383 = vpow2.f32 %v2395_v31 }
 0x2ca   :  { %4385 = vtanh.f32 %v4334_v27 }
 0x2d3   :  { %v4384_v33 = vpop.eup %4383 }
 0x2d4   :  { %v518_v35 = vadd.f32 1.0, %v4384_v33  ;;  %v4386_v39 = vpop.eup %4385 }
 0x2d6   :  { %4387 = vrcp.f32 %v518_v35 }
 0x2e0   :  { %v4388_v41 = vpop.eup %4387 }
 0x2e1   :  { %v521_v43 = vsel %vm4837_vm5, %v4386_v39, %v4388_v41 }
 0x2e2   :  { %524 = vrot.lane.b32.xlu1 %v521_v43, %s4579_s29  ;;  %522 = vrot.lane.b32.xlu0 %v521_v43, %s4578_s26 }
 0x2e6   :  { %526 = vrot.lane.b32.xlu0 %v521_v43, %s4577_s12 }
 0x334   :  { %v615_v44 = vpop.permute.xlu0 %614  ;;  %v613_v46 = vpop.permute.xlu1 %612 }
 0x335   :  { %v619_v47 = vmul.f32 %v615_v44, %v611_v24  ;;  %v618_v49 = vmul.f32 %v613_v46, %v4871_v23 }
 0x337   :  { %v4976_v50 = vadd.f32 %v619_v47, %v618_v49 }
 0x338   :  { %v617_v54 = vpop.permute.xlu1 %616 }
 0x339   :  { %4389 = vtanh.f32 %v4976_v50 }
 0x343   :  { %v4390_v53 = vpop.eup %4389 }
 0x344   :  { %v622_v57 = vmul.f32 %v4390_v53, %v617_v54 }
 0x346   :  { %3032 = vmatmul.mubr.f32.vlgmr.msra.gmra.mrb[4].mxu1 %v622_v57  ;;  %3102 = vmatmul.mubr.f32.vlgmr.msra.gmra.mrb[10].mxu0 %v622_v57 }
 0x347   :  { %3856 = vmatpush3.bf16.msra.mxu1 %v4874_v30  ;;  %3066 = vmatprep.mubr.msk.f32.mxu1 %vm4575_vm0, %v4576_v1 }
 0x348   :  { %3857 = vmatprep.subr.bf16.mxu1 %v4574_v0  ;;  %3904 = vmatpush3.bf16.msra.mxu0 %v4796_v32 }
 0x349   :  { %3905 = vmatprep.subr.bf16.mxu0 %v4574_v0  ;;  %3136 = vmatprep.mubr.msk.f32.mxu0 %vm4575_vm0, %v4576_v1 }
 0x34b   :  { %3859 = vmatpush3.bf16.msra.mxu1 %v4877_v36 }
 0x34c   :  { %3860 = vmatprep.subr.bf16.mxu1 %v4574_v0  ;;  %3907 = vmatpush3.bf16.msra.mxu0 %v4799_v34 }
 0x34d   :  { %3908 = vmatprep.subr.bf16.mxu0 %v4574_v0 }
 0x34f   :  { %3862 = vmatpush3.bf16.msra.mxu1 %v4887_v42 }
 0x350   :  { %3863 = vmatprep.subr.bf16.mxu1 %v4574_v0  ;;  %3910 = vmatpush3.bf16.msra.mxu0 %v4803_v37 }
 0x351   :  { %3911 = vmatprep.subr.bf16.mxu0 %v4574_v0 }
 0x353   :  { %3865 = vmatpush3.bf16.msra.mxu1 %v4893_v45 }
 0x354   :  { %v525_v23 = vpop.permute.xlu1 %524  ;;  %v523_v58 = vpop.permute.xlu0 %522  ;;  %3866 = vmatprep.subr.bf16.mxu1 %v4574_v0  ;;  %3913 = vmatpush3.bf16.msra.mxu0 %v4816_v51 }
 0x355   :  { %v529_v9 = vmul.f32 %v525_v23, %v521_v43  ;;  %v528_v10 = vmul.f32 0.0, %v523_v58  ;;  %3914 = vmatprep.subr.bf16.mxu0 %v4574_v0 }
 0x357   :  { %v4999_v11 = vadd.f32 %v529_v9, %v528_v10  ;;  %3868 = vmatpush3.bf16.msra.mxu1 %v4899_v48 }
 0x358   :  { %3869 = vmatprep.subr.bf16.mxu1 %v4574_v0  ;;  %3916 = vmatpush3.bf16.msra.mxu0 %v4820_v55  ;;  %v527_v14 = vpop.permute.xlu0 %526 }
 0x359   :  { %4391 = vtanh.f32 %v4999_v11  ;;  %3917 = vmatprep.subr.bf16.mxu0 %v4574_v0 }
 0x35b   :  { %3871 = vmatpush3.bf16.msra.mxu1 %v4905_v52 }
 0x35c   :  { %3872 = vmatprep.subr.bf16.mxu1 %v4574_v0  ;;  %3919 = vmatpush3.bf16.msra.mxu0 %v4831_v60 }
 0x35d   :  { %3920 = vmatprep.subr.bf16.mxu0 %v4574_v0 }
 0x35f   :  { %3874 = vmatpush3.bf16.msra.mxu1 %v4911_v56 }
 0x360   :  { %3875 = vmatprep.subr.bf16.mxu1 %v4574_v0  ;;  %3922 = vmatpush3.bf16.msra.mxu0 %v4847_v6 }
 0x361   :  { %3923 = vmatprep.subr.bf16.mxu0 %v4574_v0 }
 0x363   :  { %v4392_v12 = vpop.eup %4391  ;;  %3877 = vmatpush3.bf16.msra.mxu1 %v4917_v59 }
 0x364   :  { %v532_v17 = vmul.f32 %v4392_v12, %v527_v14  ;;  %3950 = vmatprep.subr.bf16.mxu1 %v4574_v0  ;;  %3925 = vmatpush3.bf16.msra.mxu0 %v4862_v15 }
 0x365   :  { %3926 = vmatprep.subr.bf16.mxu0 %v4574_v0 }
 0x366   :  { %3067 = vmatmul.mubr.f32.vlgmr.msra.gmra.mrb[4].mxu1 %v532_v17 }
 0x367   :  { %3952 = vmatpush3.bf16.msra.mxu1 %v4694_v5  ;;  %3206 = vmatprep.mubr.msk.f32.mxu1 %vm4575_vm0, %v4576_v1 }
 0x368   :  { %3953 = vmatprep.subr.bf16.mxu1 %v4574_v0 }
 0x36b   :  { %3955 = vmatpush3.bf16.msra.mxu1 %v4700_v7 }
 0x36c   :  { %3956 = vmatprep.subr.bf16.mxu1 %v4574_v0 }
 0x36f   :  { %3958 = vmatpush3.bf16.msra.mxu1 %v4720_v13 }
 0x370   :  { %3959 = vmatprep.subr.bf16.mxu1 %v4574_v0 }
 0x373   :  { %3961 = vmatpush3.bf16.msra.mxu1 %v4732_v16 }
 0x374   :  { %3962 = vmatprep.subr.bf16.mxu1 %v4574_v0 }
 0x377   :  { %3964 = vmatpush3.bf16.msra.mxu1 %v4742_v19 }
 0x378   :  { %3965 = vmatprep.subr.bf16.mxu1 %v4574_v0 }
 0x37b   :  { %3967 = vmatpush3.bf16.msra.mxu1 %v4752_v22 }
 0x37c   :  { %3968 = vmatprep.subr.bf16.mxu1 %v4574_v0 }
 0x37f   :  { %3970 = vmatpush3.bf16.msra.mxu1 %v4762_v25 }
 0x380   :  { %3971 = vmatprep.subr.bf16.mxu1 %v4574_v0 }
 0x383   :  { %3973 = vmatpush3.bf16.msra.mxu1 %v4772_v28 }
 0x384   :  { %3974 = vmatprep.subr.bf16.mxu1 %v4574_v0 }
 0x419   :  { %v849_v20 = vpop.f32.mrb[10].mxu0 }
 0x41a   :  { %v853_v21 = vadd.f32 %v849_v20, %v200_v18  ;;  %v3103_v24 = vpop.f32.mrb[11].mxu0 }
 0x41c   :  { %v2398_v26 = vmul.f32 -1.442695, %v853_v21 }
 0x41e   :  { %4393 = vpow2.f32 %v2398_v26 }
 0x41f   :  { %4395 = vtanh.f32 %v853_v21 }
 0x428   :  { %v4394_v27 = vpop.eup %4393 }
 0x429   :  { %v858_v29 = vadd.f32 1.0, %v4394_v27  ;;  %v4396_v31 = vpop.eup %4395  ;;  %v205_v27 = vadd.f32 %v4945_v61, %v4813_v40 }
 0x42b   :  { %4397 = vrcp.f32 %v858_v29 }
 0x435   :  { %v4398_v33 = vpop.eup %4397 }
 0x436   :  { %v861_v35 = vsel %vm4837_vm5, %v4396_v31, %v4398_v33 }
 0x437   :  { %864 = vrot.lane.b32.xlu0 %v861_v35, %s4579_s29  ;;  %862 = vrot.lane.b32.xlu1 %v861_v35, %s4578_s26 }
 0x439   :  { %v759_v39 = vpop.f32.mrb[4].mxu1 }
 0x43a   :  { %v4335_v62 = vadd.f32 %v4966_v38, %v759_v39  ;;  %v3068_v41 = vpop.f32.mrb[5].mxu1 }
 0x43b   :  { %866 = vrot.lane.b32.xlu1 %v861_v35, %s4577_s12 }
 0x43c   :  { %v2397_v43 = vmul.f32 -1.442695, %v4335_v62 }
 0x43e   :  { %4399 = vpow2.f32 %v2397_v43 }
 0x43f   :  { %4401 = vtanh.f32 %v4335_v62 }
 0x448   :  { %v4400_v44 = vpop.eup %4399 }
 0x449   :  { %v768_v46 = vadd.f32 1.0, %v4400_v44  ;;  %v4402_v47 = vpop.eup %4401 }
 0x44b   :  { %4403 = vrcp.f32 %v768_v46 }
 0x455   :  { %v4404_v49 = vpop.eup %4403 }
 0x456   :  { %v771_v53 = vsel %vm4837_vm5, %v4402_v47, %v4404_v49 }
 0x457   :  { %772 = vrot.lane.b32.xlu0 %v771_v53, %s4578_s26  ;;  %774 = vrot.lane.b32.xlu1 %v771_v53, %s4579_s29 }
 0x45b   :  { %776 = vrot.lane.b32.xlu0 %v771_v53, %s4577_s12 }
 0x4a9   :  { %v865_v54 = vpop.permute.xlu0 %864  ;;  %v863_v57 = vpop.permute.xlu1 %862 }
 0x4aa   :  { %v869_v23 = vmul.f32 %v865_v54, %v861_v35  ;;  %v868_v58 = vmul.f32 %v863_v57, %v4976_v50 }
 0x4ac   :  { %v5050_v9 = vadd.f32 %v869_v23, %v868_v58 }
 0x4ad   :  { %v867_v12 = vpop.permute.xlu1 %866 }
 0x4ae   :  { %4405 = vtanh.f32 %v5050_v9 }
 0x4b8   :  { %v4406_v10 = vpop.eup %4405 }
 0x4b9   :  { %v872_v14 = vmul.f32 %v4406_v10, %v867_v12 }
 0x4bb   :  { %3137 = vmatmul.mubr.f32.vlgmr.msra.gmra.mrb[12].mxu0 %v872_v14  ;;  %3207 = vmatmul.mubr.f32.vlgmr.msra.gmra.mrb[6].mxu1 %v872_v14 }
 0x4bc   :  { %3928 = vmatpush3.bf16.msra.mxu0 %v4874_v30  ;;  %3171 = vmatprep.mubr.msk.f32.mxu0 %vm4575_vm0, %v4576_v1 }
 0x4bd   :  { %3929 = vmatprep.subr.bf16.mxu0 %v4574_v0  ;;  %3976 = vmatpush3.bf16.msra.mxu1 %v4796_v32 }
 0x4be   :  { %3977 = vmatprep.subr.bf16.mxu1 %v4574_v0  ;;  %3241 = vmatprep.mubr.msk.f32.mxu1 %vm4575_vm0, %v4576_v1 }
 0x4c0   :  { %3931 = vmatpush3.bf16.msra.mxu0 %v4877_v36 }
 0x4c1   :  { %3932 = vmatprep.subr.bf16.mxu0 %v4574_v0  ;;  %3979 = vmatpush3.bf16.msra.mxu1 %v4799_v34 }
 0x4c2   :  { %3980 = vmatprep.subr.bf16.mxu1 %v4574_v0 }
 0x4c4   :  { %3934 = vmatpush3.bf16.msra.mxu0 %v4887_v42 }
 0x4c5   :  { %3935 = vmatprep.subr.bf16.mxu0 %v4574_v0  ;;  %3982 = vmatpush3.bf16.msra.mxu1 %v4803_v37 }
 0x4c6   :  { %3983 = vmatprep.subr.bf16.mxu1 %v4574_v0 }
 0x4c8   :  { %3937 = vmatpush3.bf16.msra.mxu0 %v4893_v45 }
 0x4c9   :  { %v773_v50 = vpop.permute.xlu0 %772  ;;  %v775_v17 = vpop.permute.xlu1 %774  ;;  %3938 = vmatprep.subr.bf16.mxu0 %v4574_v0  ;;  %3985 = vmatpush3.bf16.msra.mxu1 %v4816_v51 }
 0x4ca   :  { %v778_v18 = vmul.f32 %v773_v50, %v4999_v11  ;;  %v779_v20 = vmul.f32 %v775_v17, %v771_v53  ;;  %3986 = vmatprep.subr.bf16.mxu1 %v4574_v0 }
 0x4cc   :  { %v5074_v21 = vadd.f32 %v779_v20, %v778_v18  ;;  %3940 = vmatpush3.bf16.msra.mxu0 %v4899_v48 }
 0x4cd   :  { %3941 = vmatprep.subr.bf16.mxu0 %v4574_v0  ;;  %3988 = vmatpush3.bf16.msra.mxu1 %v4820_v55  ;;  %v777_v24 = vpop.permute.xlu0 %776 }
 0x4ce   :  { %4407 = vtanh.f32 %v5074_v21  ;;  %3989 = vmatprep.subr.bf16.mxu1 %v4574_v0 }
 0x4d0   :  { %3943 = vmatpush3.bf16.msra.mxu0 %v4905_v52 }
 0x4d1   :  { %3944 = vmatprep.subr.bf16.mxu0 %v4574_v0  ;;  %3991 = vmatpush3.bf16.msra.mxu1 %v4831_v60 }
 0x4d2   :  { %3992 = vmatprep.subr.bf16.mxu1 %v4574_v0 }
 0x4d4   :  { %3946 = vmatpush3.bf16.msra.mxu0 %v4911_v56 }
 0x4d5   :  { %3947 = vmatprep.subr.bf16.mxu0 %v4574_v0  ;;  %3994 = vmatpush3.bf16.msra.mxu1 %v4847_v6 }
 0x4d6   :  { %3995 = vmatprep.subr.bf16.mxu1 %v4574_v0 }
 0x4d8   :  { %v4408_v11 = vpop.eup %4407  ;;  %3949 = vmatpush3.bf16.msra.mxu0 %v4917_v59 }
 0x4d9   :  { %v782_v26 = vmul.f32 %v4408_v11, %v777_v24  ;;  %4022 = vmatprep.subr.bf16.mxu0 %v4574_v0  ;;  %3997 = vmatpush3.bf16.msra.mxu1 %v4862_v15 }
 0x4da   :  { %3998 = vmatprep.subr.bf16.mxu1 %v4574_v0 }
 0x4db   :  { %3172 = vmatmul.mubr.f32.vlgmr.msra.gmra.mrb[12].mxu0 %v782_v26 }
 0x4dc   :  { %4024 = vmatpush3.bf16.msra.mxu0 %v4694_v5  ;;  %3311 = vmatprep.mubr.msk.f32.mxu0 %vm4575_vm0, %v4576_v1 }
 0x4dd   :  { %4025 = vmatprep.subr.bf16.mxu0 %v4574_v0 }
 0x4e0   :  { %4027 = vmatpush3.bf16.msra.mxu0 %v4700_v7 }
 0x4e1   :  { %4028 = vmatprep.subr.bf16.mxu0 %v4574_v0 }
 0x4e4   :  { %4030 = vmatpush3.bf16.msra.mxu0 %v4720_v13 }
 0x4e5   :  { %4031 = vmatprep.subr.bf16.mxu0 %v4574_v0 }
 0x4e8   :  { %4033 = vmatpush3.bf16.msra.mxu0 %v4732_v16 }
 0x4e9   :  { %4034 = vmatprep.subr.bf16.mxu0 %v4574_v0 }
 0x4ec   :  { %4036 = vmatpush3.bf16.msra.mxu0 %v4742_v19 }
 0x4ed   :  { %4037 = vmatprep.subr.bf16.mxu0 %v4574_v0 }
 0x4f0   :  { %4039 = vmatpush3.bf16.msra.mxu0 %v4752_v22 }
 0x4f1   :  { %4040 = vmatprep.subr.bf16.mxu0 %v4574_v0 }
 0x4f4   :  { %4042 = vmatpush3.bf16.msra.mxu0 %v4762_v25 }
 0x4f5   :  { %4043 = vmatprep.subr.bf16.mxu0 %v4574_v0 }
 0x4f8   :  { %4045 = vmatpush3.bf16.msra.mxu0 %v4772_v28 }
 0x4f9   :  { %4046 = vmatprep.subr.bf16.mxu0 %v4574_v0 }
 0x58e   :  { %v1099_v29 = vpop.f32.mrb[6].mxu1 }
 0x58f   :  { %v1103_v31 = vadd.f32 %v1099_v29, %v205_v27  ;;  %v3208_v33 = vpop.f32.mrb[7].mxu1 }
 0x591   :  { %v2400_v35 = vmul.f32 -1.442695, %v1103_v31 }
 0x593   :  { %4409 = vpow2.f32 %v2400_v35  ;;  %v210_v35 = vadd.f32 %v4813_v40, %v4951_v3 }
 0x594   :  { %4411 = vtanh.f32 %v1103_v31 }
 0x59d   :  { %v4410_v39 = vpop.eup %4409 }
 0x59e   :  { %v1108_v62 = vadd.f32 1.0, %v4410_v39  ;;  %v4412_v41 = vpop.eup %4411 }
 0x5a0   :  { %4413 = vrcp.f32 %v1108_v62 }
 0x5aa   :  { %v4414_v43 = vpop.eup %4413 }
 0x5ab   :  { %v1111_v44 = vsel %vm4837_vm5, %v4412_v41, %v4414_v43 }
 0x5ac   :  { %1114 = vrot.lane.b32.xlu0 %v1111_v44, %s4579_s29  ;;  %1112 = vrot.lane.b32.xlu1 %v1111_v44, %s4578_s26 }
 0x5ae   :  { %v1009_v46 = vpop.f32.mrb[12].mxu0 }
 0x5af   :  { %v4336_v61 = vadd.f32 %v4966_v38, %v1009_v46  ;;  %v3173_v47 = vpop.f32.mrb[13].mxu0 }
 0x5b0   :  { %1116 = vrot.lane.b32.xlu1 %v1111_v44, %s4577_s12 }
 0x5b1   :  { %v2399_v49 = vmul.f32 -1.442695, %v4336_v61 }
 0x5b3   :  { %4415 = vpow2.f32 %v2399_v49 }
 0x5b4   :  { %4417 = vtanh.f32 %v4336_v61 }
 0x5bd   :  { %v4416_v53 = vpop.eup %4415 }
 0x5be   :  { %v1018_v54 = vadd.f32 1.0, %v4416_v53  ;;  %v4418_v57 = vpop.eup %4417 }
 0x5c0   :  { %4419 = vrcp.f32 %v1018_v54 }
 0x5ca   :  { %v4420_v23 = vpop.eup %4419 }
 0x5cb   :  { %v1021_v58 = vsel %vm4837_vm5, %v4418_v57, %v4420_v23 }
 0x5cc   :  { %1024 = vrot.lane.b32.xlu1 %v1021_v58, %s4579_s29  ;;  %1022 = vrot.lane.b32.xlu0 %v1021_v58, %s4578_s26 }
 0x5d0   :  { %1026 = vrot.lane.b32.xlu0 %v1021_v58, %s4577_s12 }
 0x61e   :  { %v1115_v10 = vpop.permute.xlu0 %1114  ;;  %v1113_v12 = vpop.permute.xlu1 %1112 }
 0x61f   :  { %v1119_v14 = vmul.f32 %v1115_v10, %v1111_v44  ;;  %v1118_v50 = vmul.f32 %v1113_v12, %v5050_v9 }
 0x621   :  { %v5125_v17 = vadd.f32 %v1119_v14, %v1118_v50 }
 0x622   :  { %v1117_v20 = vpop.permute.xlu1 %1116 }
 0x623   :  { %4421 = vtanh.f32 %v5125_v17 }
 0x62d   :  { %v4422_v18 = vpop.eup %4421 }
 0x62e   :  { %v1122_v11 = vmul.f32 %v4422_v18, %v1117_v20 }
 0x630   :  { %3242 = vmatmul.mubr.f32.vlgmr.msra.gmra.mrb[8].mxu1 %v1122_v11  ;;  %3312 = vmatmul.mubr.f32.vlgmr.msra.gmra.mrb[14].mxu0 %v1122_v11 }
 0x631   :  { %4000 = vmatpush3.bf16.msra.mxu1 %v4874_v30  ;;  %3276 = vmatprep.mubr.msk.f32.mxu1 %vm4575_vm0, %v4576_v1 }
 0x632   :  { %4001 = vmatprep.subr.bf16.mxu1 %v4574_v0  ;;  %4048 = vmatpush3.bf16.msra.mxu0 %v4796_v32 }
 0x633   :  { %4049 = vmatprep.subr.bf16.mxu0 %v4574_v0  ;;  %3346 = vmatprep.mubr.msk.f32.mxu0 %vm4575_vm0, %v4576_v1 }
 0x635   :  { %4003 = vmatpush3.bf16.msra.mxu1 %v4877_v36 }
 0x636   :  { %4004 = vmatprep.subr.bf16.mxu1 %v4574_v0  ;;  %4051 = vmatpush3.bf16.msra.mxu0 %v4799_v34 }
 0x637   :  { %4052 = vmatprep.subr.bf16.mxu0 %v4574_v0 }
 0x639   :  { %4006 = vmatpush3.bf16.msra.mxu1 %v4887_v42 }
 0x63a   :  { %4007 = vmatprep.subr.bf16.mxu1 %v4574_v0  ;;  %4054 = vmatpush3.bf16.msra.mxu0 %v4803_v37 }
 0x63b   :  { %4055 = vmatprep.subr.bf16.mxu0 %v4574_v0 }
 0x63d   :  { %4009 = vmatpush3.bf16.msra.mxu1 %v4893_v45 }
 0x63e   :  { %v1025_v9 = vpop.permute.xlu1 %1024  ;;  %v1023_v24 = vpop.permute.xlu0 %1022  ;;  %4010 = vmatprep.subr.bf16.mxu1 %v4574_v0  ;;  %4057 = vmatpush3.bf16.msra.mxu0 %v4816_v51 }
 0x63f   :  { %v1029_v26 = vmul.f32 %v1025_v9, %v1021_v58  ;;  %v1028_v27 = vmul.f32 %v1023_v24, %v5074_v21  ;;  %4058 = vmatprep.subr.bf16.mxu0 %v4574_v0 }
 0x641   :  { %v5149_v29 = vadd.f32 %v1029_v26, %v1028_v27  ;;  %4012 = vmatpush3.bf16.msra.mxu1 %v4899_v48 }
 0x642   :  { %4013 = vmatprep.subr.bf16.mxu1 %v4574_v0  ;;  %4060 = vmatpush3.bf16.msra.mxu0 %v4820_v55  ;;  %v1027_v31 = vpop.permute.xlu0 %1026 }
 0x643   :  { %4423 = vtanh.f32 %v5149_v29  ;;  %4061 = vmatprep.subr.bf16.mxu0 %v4574_v0 }
 0x645   :  { %4015 = vmatpush3.bf16.msra.mxu1 %v4905_v52 }
 0x646   :  { %4016 = vmatprep.subr.bf16.mxu1 %v4574_v0  ;;  %4063 = vmatpush3.bf16.msra.mxu0 %v4831_v60 }
 0x647   :  { %4064 = vmatprep.subr.bf16.mxu0 %v4574_v0 }
 0x649   :  { %4018 = vmatpush3.bf16.msra.mxu1 %v4911_v56 }
 0x64a   :  { %4019 = vmatprep.subr.bf16.mxu1 %v4574_v0  ;;  %4066 = vmatpush3.bf16.msra.mxu0 %v4847_v6 }
 0x64b   :  { %4067 = vmatprep.subr.bf16.mxu0 %v4574_v0 }
 0x64d   :  { %v4424_v21 = vpop.eup %4423  ;;  %4021 = vmatpush3.bf16.msra.mxu1 %v4917_v59 }
 0x64e   :  { %v1032_v33 = vmul.f32 %v4424_v21, %v1027_v31  ;;  %4094 = vmatprep.subr.bf16.mxu1 %v4574_v0  ;;  %4069 = vmatpush3.bf16.msra.mxu0 %v4862_v15 }
 0x64f   :  { %4070 = vmatprep.subr.bf16.mxu0 %v4574_v0 }
 0x650   :  { %3277 = vmatmul.mubr.f32.vlgmr.msra.gmra.mrb[8].mxu1 %v1032_v33 }
 0x651   :  { %4096 = vmatpush3.bf16.msra.mxu1 %v4694_v5  ;;  %3416 = vmatprep.mubr.msk.f32.mxu1 %vm4575_vm0, %v4576_v1 }
 0x652   :  { %4097 = vmatprep.subr.bf16.mxu1 %v4574_v0 }
 0x655   :  { %4099 = vmatpush3.bf16.msra.mxu1 %v4700_v7 }
 0x656   :  { %4100 = vmatprep.subr.bf16.mxu1 %v4574_v0 }
 0x659   :  { %4102 = vmatpush3.bf16.msra.mxu1 %v4720_v13 }
 0x65a   :  { %4103 = vmatprep.subr.bf16.mxu1 %v4574_v0 }
 0x65d   :  { %4105 = vmatpush3.bf16.msra.mxu1 %v4732_v16 }
 0x65e   :  { %4106 = vmatprep.subr.bf16.mxu1 %v4574_v0 }
 0x661   :  { %4108 = vmatpush3.bf16.msra.mxu1 %v4742_v19 }
 0x662   :  { %4109 = vmatprep.subr.bf16.mxu1 %v4574_v0 }
 0x665   :  { %4111 = vmatpush3.bf16.msra.mxu1 %v4752_v22 }
 0x666   :  { %4112 = vmatprep.subr.bf16.mxu1 %v4574_v0 }
 0x669   :  { %4114 = vmatpush3.bf16.msra.mxu1 %v4762_v25 }
 0x66a   :  { %4115 = vmatprep.subr.bf16.mxu1 %v4574_v0 }
 0x66d   :  { %4117 = vmatpush3.bf16.msra.mxu1 %v4772_v28 }
 0x66e   :  { %4118 = vmatprep.subr.bf16.mxu1 %v4574_v0 }
 0x703   :  { %v1349_v39 = vpop.f32.mrb[14].mxu0 }
 0x704   :  { %v1353_v62 = vadd.f32 %v1349_v39, %v210_v35  ;;  %v3313_v41 = vpop.f32.mrb[15].mxu0 }
 0x706   :  { %v2402_v43 = vmul.f32 -1.442695, %v1353_v62 }
 0x708   :  { %4425 = vpow2.f32 %v2402_v43 }
 0x709   :  { %4427 = vtanh.f32 %v1353_v62  ;;  %v5264_v62 = vld [vmem:[%s5463_s3] ss:$0 sm:$0xff] }
 0x70a   :  { %v215_v41 = vadd.f32 %v5264_v62, %v4949_v2 }
 0x712   :  { %v4426_v44 = vpop.eup %4425 }
 0x713   :  { %v1358_v46 = vadd.f32 1.0, %v4426_v44  ;;  %v4428_v61 = vpop.eup %4427 }
 0x715   :  { %4429 = vrcp.f32 %v1358_v46 }
 0x71f   :  { %v4430_v47 = vpop.eup %4429 }
 0x720   :  { %v1361_v49 = vsel %vm4837_vm5, %v4428_v61, %v4430_v47 }
 0x721   :  { %1364 = vrot.lane.b32.xlu0 %v1361_v49, %s4579_s29  ;;  %1362 = vrot.lane.b32.xlu1 %v1361_v49, %s4578_s26 }
 0x723   :  { %v1259_v53 = vpop.f32.mrb[8].mxu1 }
 0x724   :  { %v4337_v40 = vadd.f32 %v4966_v38, %v1259_v53  ;;  %v3278_v3 = vpop.f32.mrb[9].mxu1 }
 0x725   :  { %1366 = vrot.lane.b32.xlu1 %v1361_v49, %s4577_s12 }
 0x726   :  { %v2401_v54 = vmul.f32 -1.442695, %v4337_v40 }
 0x728   :  { %4431 = vpow2.f32 %v2401_v54 }
 0x729   :  { %4433 = vtanh.f32 %v4337_v40 }
 0x732   :  { %v4432_v57 = vpop.eup %4431 }
 0x733   :  { %v1268_v23 = vadd.f32 1.0, %v4432_v57  ;;  %v4434_v58 = vpop.eup %4433 }
 0x735   :  { %4435 = vrcp.f32 %v1268_v23 }
 0x73f   :  { %v4436_v10 = vpop.eup %4435 }
 0x740   :  { %v1271_v12 = vsel %vm4837_vm5, %v4434_v58, %v4436_v10 }
 0x741   :  { %1272 = vrot.lane.b32.xlu0 %v1271_v12, %s4578_s26  ;;  %1274 = vrot.lane.b32.xlu1 %v1271_v12, %s4579_s29 }
 0x745   :  { %1276 = vrot.lane.b32.xlu0 %v1271_v12, %s4577_s12 }
 0x793   :  { %v1365_v14 = vpop.permute.xlu0 %1364  ;;  %v1363_v50 = vpop.permute.xlu1 %1362 }
 0x794   :  { %v1369_v18 = vmul.f32 %v1365_v14, %v1361_v49  ;;  %v1368_v20 = vmul.f32 %v1363_v50, %v5125_v17 }
 0x796   :  { %v5200_v11 = vadd.f32 %v1369_v18, %v1368_v20 }
 0x797   :  { %v1367_v24 = vpop.permute.xlu1 %1366 }
 0x798   :  { %4437 = vtanh.f32 %v5200_v11 }
 0x7a2   :  { %v4438_v9 = vpop.eup %4437 }
 0x7a3   :  { %v1372_v26 = vmul.f32 %v4438_v9, %v1367_v24 }
 0x7a5   :  { %3347 = vmatmul.mubr.f32.vlgmr.msra.gmra.mrb[16].mxu0 %v1372_v26  ;;  %3417 = vmatmul.mubr.f32.vlgmr.msra.gmra.mrb[10].mxu1 %v1372_v26 }
 0x7a6   :  { %4072 = vmatpush3.bf16.msra.mxu0 %v4874_v30  ;;  %3381 = vmatprep.mubr.msk.f32.mxu0 %vm4575_vm0, %v4576_v1 }
 0x7a7   :  { %4073 = vmatprep.subr.bf16.mxu0 %v4574_v0  ;;  %4120 = vmatpush3.bf16.msra.mxu1 %v4796_v32 }
 0x7a8   :  { %4121 = vmatprep.subr.bf16.mxu1 %v4574_v0  ;;  %3451 = vmatprep.mubr.msk.f32.mxu1 %vm4575_vm0, %v4576_v1 }
 0x7aa   :  { %4075 = vmatpush3.bf16.msra.mxu0 %v4877_v36 }
 0x7ab   :  { %4076 = vmatprep.subr.bf16.mxu0 %v4574_v0  ;;  %4123 = vmatpush3.bf16.msra.mxu1 %v4799_v34 }
 0x7ac   :  { %4124 = vmatprep.subr.bf16.mxu1 %v4574_v0 }
 0x7ae   :  { %4078 = vmatpush3.bf16.msra.mxu0 %v4887_v42 }
 0x7af   :  { %4079 = vmatprep.subr.bf16.mxu0 %v4574_v0  ;;  %4126 = vmatpush3.bf16.msra.mxu1 %v4803_v37 }
 0x7b0   :  { %4127 = vmatprep.subr.bf16.mxu1 %v4574_v0 }
 0x7b2   :  { %4081 = vmatpush3.bf16.msra.mxu0 %v4893_v45 }
 0x7b3   :  { %v1273_v17 = vpop.permute.xlu0 %1272  ;;  %v1275_v27 = vpop.permute.xlu1 %1274  ;;  %4082 = vmatprep.subr.bf16.mxu0 %v4574_v0  ;;  %4129 = vmatpush3.bf16.msra.mxu1 %v4816_v51 }
 0x7b4   :  { %v1278_v21 = vmul.f32 %v1273_v17, %v5149_v29  ;;  %v1279_v31 = vmul.f32 %v1275_v27, %v1271_v12  ;;  %4130 = vmatprep.subr.bf16.mxu1 %v4574_v0 }
 0x7b6   :  { %v5224_v33 = vadd.f32 %v1279_v31, %v1278_v21  ;;  %4084 = vmatpush3.bf16.msra.mxu0 %v4899_v48 }
 0x7b7   :  { %4085 = vmatprep.subr.bf16.mxu0 %v4574_v0  ;;  %4132 = vmatpush3.bf16.msra.mxu1 %v4820_v55  ;;  %v1277_v35 = vpop.permute.xlu0 %1276 }
 0x7b8   :  { %4439 = vtanh.f32 %v5224_v33  ;;  %4133 = vmatprep.subr.bf16.mxu1 %v4574_v0 }
 0x7ba   :  { %4087 = vmatpush3.bf16.msra.mxu0 %v4905_v52 }
 0x7bb   :  { %4088 = vmatprep.subr.bf16.mxu0 %v4574_v0  ;;  %4135 = vmatpush3.bf16.msra.mxu1 %v4831_v60 }
 0x7bc   :  { %4136 = vmatprep.subr.bf16.mxu1 %v4574_v0 }
 0x7be   :  { %4090 = vmatpush3.bf16.msra.mxu0 %v4911_v56 }
 0x7bf   :  { %4091 = vmatprep.subr.bf16.mxu0 %v4574_v0  ;;  %4138 = vmatpush3.bf16.msra.mxu1 %v4847_v6 }
 0x7c0   :  { %4139 = vmatprep.subr.bf16.mxu1 %v4574_v0 }
 0x7c2   :  { %v4440_v29 = vpop.eup %4439  ;;  %4093 = vmatpush3.bf16.msra.mxu0 %v4917_v59 }
 0x7c3   :  { %v1282_v39 = vmul.f32 %v4440_v29, %v1277_v35  ;;  %4166 = vmatprep.subr.bf16.mxu0 %v4574_v0  ;;  %4141 = vmatpush3.bf16.msra.mxu1 %v4862_v15 }
 0x7c4   :  { %4142 = vmatprep.subr.bf16.mxu1 %v4574_v0 }
 0x7c5   :  { %3382 = vmatmul.mubr.f32.vlgmr.msra.gmra.mrb[16].mxu0 %v1282_v39 }
 0x7c6   :  { %4168 = vmatpush3.bf16.msra.mxu0 %v4694_v5  ;;  %3521 = vmatprep.mubr.msk.f32.mxu0 %vm4575_vm0, %v4576_v1 }
 0x7c7   :  { %4169 = vmatprep.subr.bf16.mxu0 %v4574_v0 }
 0x7ca   :  { %4171 = vmatpush3.bf16.msra.mxu0 %v4700_v7 }
 0x7cb   :  { %4172 = vmatprep.subr.bf16.mxu0 %v4574_v0 }
 0x7ce   :  { %4174 = vmatpush3.bf16.msra.mxu0 %v4720_v13 }
 0x7cf   :  { %4175 = vmatprep.subr.bf16.mxu0 %v4574_v0 }
 0x7d2   :  { %4177 = vmatpush3.bf16.msra.mxu0 %v4732_v16 }
 0x7d3   :  { %4178 = vmatprep.subr.bf16.mxu0 %v4574_v0 }
 0x7d6   :  { %4180 = vmatpush3.bf16.msra.mxu0 %v4742_v19 }
 0x7d7   :  { %4181 = vmatprep.subr.bf16.mxu0 %v4574_v0 }
 0x7da   :  { %4183 = vmatpush3.bf16.msra.mxu0 %v4752_v22 }
 0x7db   :  { %4184 = vmatprep.subr.bf16.mxu0 %v4574_v0 }
 0x7de   :  { %4186 = vmatpush3.bf16.msra.mxu0 %v4762_v25 }
 0x7df   :  { %4187 = vmatprep.subr.bf16.mxu0 %v4574_v0 }
 0x7e2   :  { %4189 = vmatpush3.bf16.msra.mxu0 %v4772_v28 }
 0x7e3   :  { %4190 = vmatprep.subr.bf16.mxu0 %v4574_v0 }
 0x878   :  { %v1599_v43 = vpop.f32.mrb[10].mxu1 }
 0x879   :  { %v1603_v44 = vadd.f32 %v1599_v43, %v215_v41  ;;  %v3418_v46 = vpop.f32.mrb[11].mxu1 }
 0x87b   :  { %v2404_v61 = vmul.f32 -1.442695, %v1603_v44 }
 0x87d   :  { %4441 = vpow2.f32 %v2404_v61 }
 0x87e   :  { %4443 = vtanh.f32 %v1603_v44 }
 0x887   :  { %v4442_v47 = vpop.eup %4441 }
 0x888   :  { %v1608_v49 = vadd.f32 1.0, %v4442_v47  ;;  %v4444_v53 = vpop.eup %4443 }
 0x88a   :  { %4445 = vrcp.f32 %v1608_v49 }
 0x894   :  { %v4446_v40 = vpop.eup %4445 }
 0x895   :  { %v1611_v3 = vsel %vm4837_vm5, %v4444_v53, %v4446_v40 }
 0x896   :  { %1614 = vrot.lane.b32.xlu0 %v1611_v3, %s4579_s29  ;;  %1612 = vrot.lane.b32.xlu1 %v1611_v3, %s4578_s26 }
 0x898   :  { %v1509_v54 = vpop.f32.mrb[16].mxu0 }
 0x899   :  { %v4338_v2 = vadd.f32 %v4966_v38, %v1509_v54  ;;  %v3383_v57 = vpop.f32.mrb[17].mxu0 }
 0x89a   :  { %1616 = vrot.lane.b32.xlu1 %v1611_v3, %s4577_s12 }
 0x89b   :  { %v2403_v23 = vmul.f32 -1.442695, %v4338_v2 }
 0x89d   :  { %4447 = vpow2.f32 %v2403_v23 }
 0x89e   :  { %4449 = vtanh.f32 %v4338_v2 }
 0x8a7   :  { %v4448_v58 = vpop.eup %4447 }
 0x8a8   :  { %v1518_v10 = vadd.f32 1.0, %v4448_v58  ;;  %v4450_v12 = vpop.eup %4449 }
 0x8aa   :  { %4451 = vrcp.f32 %v1518_v10 }
 0x8b4   :  { %v4452_v14 = vpop.eup %4451 }
 0x8b5   :  { %v1521_v50 = vsel %vm4837_vm5, %v4450_v12, %v4452_v14 }
 0x8b6   :  { %1524 = vrot.lane.b32.xlu1 %v1521_v50, %s4579_s29  ;;  %1522 = vrot.lane.b32.xlu0 %v1521_v50, %s4578_s26 }
 0x8ba   :  { %1526 = vrot.lane.b32.xlu0 %v1521_v50, %s4577_s12 }
 0x908   :  { %v1615_v38 = vpop.permute.xlu0 %1614  ;;  %v1613_v18 = vpop.permute.xlu1 %1612 }
 0x909   :  { %v1619_v20 = vmul.f32 %v1615_v38, %v1611_v3  ;;  %v1618_v9 = vmul.f32 %v1613_v18, %v5200_v11 }
 0x90b   :  { %v5280_v24 = vadd.f32 %v1619_v20, %v1618_v9 }
 0x90c   :  { %v1617_v17 = vpop.permute.xlu1 %1616 }
 0x90d   :  { %4453 = vtanh.f32 %v5280_v24 }
 0x917   :  { %v4454_v26 = vpop.eup %4453 }
 0x918   :  { %v1622_v27 = vmul.f32 %v4454_v26, %v1617_v17 }
 0x91a   :  { %3452 = vmatmul.mubr.f32.vlgmr.msra.gmra.mrb[12].mxu1 %v1622_v27  ;;  %3522 = vmatmul.mubr.f32.vlgmr.msra.gmra.mrb[18].mxu0 %v1622_v27 }
 0x91b   :  { %4144 = vmatpush3.bf16.msra.mxu1 %v4874_v30  ;;  %3486 = vmatprep.mubr.msk.f32.mxu1 %vm4575_vm0, %v4576_v1 }
 0x91c   :  { %4145 = vmatprep.subr.bf16.mxu1 %v4574_v0  ;;  %4192 = vmatpush3.bf16.msra.mxu0 %v4796_v32 }
 0x91d   :  { %4193 = vmatprep.subr.bf16.mxu0 %v4574_v0  ;;  %3556 = vmatprep.mubr.msk.f32.mxu0 %vm4575_vm0, %v4576_v1 }
 0x91f   :  { %4147 = vmatpush3.bf16.msra.mxu1 %v4877_v36 }
 0x920   :  { %4148 = vmatprep.subr.bf16.mxu1 %v4574_v0  ;;  %4195 = vmatpush3.bf16.msra.mxu0 %v4799_v34 }
 0x921   :  { %4196 = vmatprep.subr.bf16.mxu0 %v4574_v0 }
 0x923   :  { %4150 = vmatpush3.bf16.msra.mxu1 %v4887_v42 }
 0x924   :  { %4151 = vmatprep.subr.bf16.mxu1 %v4574_v0  ;;  %4198 = vmatpush3.bf16.msra.mxu0 %v4803_v37 }
 0x925   :  { %4199 = vmatprep.subr.bf16.mxu0 %v4574_v0 }
 0x927   :  { %4153 = vmatpush3.bf16.msra.mxu1 %v4893_v45 }
 0x928   :  { %v1525_v11 = vpop.permute.xlu1 %1524  ;;  %v1523_v21 = vpop.permute.xlu0 %1522  ;;  %4154 = vmatprep.subr.bf16.mxu1 %v4574_v0  ;;  %4201 = vmatpush3.bf16.msra.mxu0 %v4816_v51 }
 0x929   :  { %v1529_v31 = vmul.f32 %v1525_v11, %v1521_v50  ;;  %v1528_v29 = vmul.f32 %v1523_v21, %v5224_v33  ;;  %4202 = vmatprep.subr.bf16.mxu0 %v4574_v0 }
 0x92b   :  { %v5304_v35 = vadd.f32 %v1529_v31, %v1528_v29  ;;  %4156 = vmatpush3.bf16.msra.mxu1 %v4899_v48 }
 0x92c   :  { %4157 = vmatprep.subr.bf16.mxu1 %v4574_v0  ;;  %4204 = vmatpush3.bf16.msra.mxu0 %v4820_v55  ;;  %v1527_v39 = vpop.permute.xlu0 %1526 }
 0x92d   :  { %4455 = vtanh.f32 %v5304_v35  ;;  %4205 = vmatprep.subr.bf16.mxu0 %v4574_v0 }
 0x92f   :  { %4159 = vmatpush3.bf16.msra.mxu1 %v4905_v52 }
 0x930   :  { %4160 = vmatprep.subr.bf16.mxu1 %v4574_v0  ;;  %4207 = vmatpush3.bf16.msra.mxu0 %v4831_v60 }
 0x931   :  { %4208 = vmatprep.subr.bf16.mxu0 %v4574_v0 }
 0x933   :  { %4162 = vmatpush3.bf16.msra.mxu1 %v4911_v56 }
 0x934   :  { %4163 = vmatprep.subr.bf16.mxu1 %v4574_v0  ;;  %4210 = vmatpush3.bf16.msra.mxu0 %v4847_v6 }
 0x935   :  { %4211 = vmatprep.subr.bf16.mxu0 %v4574_v0 }
 0x937   :  { %v4456_v33 = vpop.eup %4455  ;;  %4165 = vmatpush3.bf16.msra.mxu1 %v4917_v59 }
 0x938   :  { %v1532_v41 = vmul.f32 %v4456_v33, %v1527_v39  ;;  %4238 = vmatprep.subr.bf16.mxu1 %v4574_v0  ;;  %4213 = vmatpush3.bf16.msra.mxu0 %v4862_v15 }
 0x939   :  { %4214 = vmatprep.subr.bf16.mxu0 %v4574_v0 }
 0x93a   :  { %3487 = vmatmul.mubr.f32.vlgmr.msra.gmra.mrb[12].mxu1 %v1532_v41 }
 0x93b   :  { %4240 = vmatpush3.bf16.msra.mxu1 %v4694_v5  ;;  %3626 = vmatprep.mubr.msk.f32.mxu1 %vm4575_vm0, %v4576_v1  ;;  %v220_v5 = vadd.f32 %v5264_v62, %v4955_v8  ;;  %v5350_v8 = vld [vmem:[%s5466_s6] ss:$0 sm:$0xff] }
 0x93c   :  { %4241 = vmatprep.subr.bf16.mxu1 %v4574_v0 }
 0x93f   :  { %4243 = vmatpush3.bf16.msra.mxu1 %v4700_v7 }
 0x940   :  { %4244 = vmatprep.subr.bf16.mxu1 %v4574_v0 }
 0x943   :  { %4246 = vmatpush3.bf16.msra.mxu1 %v4720_v13 }
 0x944   :  { %4247 = vmatprep.subr.bf16.mxu1 %v4574_v0 }
 0x947   :  { %4249 = vmatpush3.bf16.msra.mxu1 %v4732_v16 }
 0x948   :  { %4250 = vmatprep.subr.bf16.mxu1 %v4574_v0 }
 0x94b   :  { %4252 = vmatpush3.bf16.msra.mxu1 %v4742_v19 }
 0x94c   :  { %4253 = vmatprep.subr.bf16.mxu1 %v4574_v0 }
 0x94f   :  { %4255 = vmatpush3.bf16.msra.mxu1 %v4752_v22 }
 0x950   :  { %4256 = vmatprep.subr.bf16.mxu1 %v4574_v0 }
 0x953   :  { %4258 = vmatpush3.bf16.msra.mxu1 %v4762_v25 }
 0x954   :  { %4259 = vmatprep.subr.bf16.mxu1 %v4574_v0 }
 0x957   :  { %4261 = vmatpush3.bf16.msra.mxu1 %v4772_v28 }
 0x958   :  { %4262 = vmatprep.subr.bf16.mxu1 %v4574_v0 }
 0x9ed   :  { %v1849_v7 = vpop.f32.mrb[18].mxu0 }
 0x9ee   :  { %v1853_v13 = vadd.f32 %v1849_v7, %v220_v5  ;;  %v3523_v16 = vpop.f32.mrb[19].mxu0 }
 0x9f0   :  { %v2406_v19 = vmul.f32 -1.442695, %v1853_v13 }
 0x9f2   :  { %4457 = vpow2.f32 %v2406_v19 }
 0x9f3   :  { %4459 = vtanh.f32 %v1853_v13 }
 0x9fc   :  { %v4458_v43 = vpop.eup %4457 }
 0x9fd   :  { %v1858_v22 = vadd.f32 1.0, %v4458_v43  ;;  %v4460_v44 = vpop.eup %4459 }
 0x9ff   :  { %4461 = vrcp.f32 %v1858_v22 }
 0xa09   :  { %v4462_v25 = vpop.eup %4461 }
 0xa0a   :  { %v1861_v46 = vsel %vm4837_vm5, %v4460_v44, %v4462_v25 }
 0xa0b   :  { %1864 = vrot.lane.b32.xlu0 %v1861_v46, %s4579_s29  ;;  %1862 = vrot.lane.b32.xlu1 %v1861_v46, %s4578_s26 }
 0xa0d   :  { %v1759_v28 = vpop.f32.mrb[12].mxu1 }
 0xa0e   :  { %v4339_v61 = vadd.f32 %v5350_v8, %v1759_v28  ;;  %v3488_v47 = vpop.f32.mrb[13].mxu1 }
 0xa0f   :  { %1866 = vrot.lane.b32.xlu1 %v1861_v46, %s4577_s12 }
 0xa10   :  { %v2405_v49 = vmul.f32 -1.442695, %v4339_v61 }
 0xa12   :  { %4463 = vpow2.f32 %v2405_v49  ;;  %v2283_v49 = vld [vmem:[#allocation6] sm:$0xff] }
 0xa13   :  { %4465 = vtanh.f32 %v4339_v61 }
 0xa1c   :  { %v4464_v53 = vpop.eup %4463 }
 0xa1d   :  { %v1768_v40 = vadd.f32 1.0, %v4464_v53  ;;  %v4466_v3 = vpop.eup %4465  ;;  %v2285_v53 = vld [vmem:[#allocation6 + $0x10] sm:$0xff] }
 0xa1f   :  { %4467 = vrcp.f32 %v1768_v40 }
 0xa29   :  { %v4468_v54 = vpop.eup %4467 }
 0xa2a   :  { %v1771_v2 = vsel %vm4837_vm5, %v4466_v3, %v4468_v54  ;;  %v2286_v3 = vld [vmem:[#allocation6 + $0x18] sm:$0xff] }
 0xa2b   :  { %1772 = vrot.lane.b32.xlu0 %v1771_v2, %s4578_s26  ;;  %1774 = vrot.lane.b32.xlu1 %v1771_v2, %s4579_s29  ;;  %v4314_v54 = vpack.c.bf16 %v2286_v3, %v2285_v53 }
 0xa2f   :  { %1776 = vrot.lane.b32.xlu0 %v1771_v2, %s4577_s12 }
 0xa7d   :  { %v1865_v57 = vpop.permute.xlu0 %1864  ;;  %v1863_v23 = vpop.permute.xlu1 %1862 }
 0xa7e   :  { %v1869_v58 = vmul.f32 %v1865_v57, %v1861_v46  ;;  %v1868_v10 = vmul.f32 %v1863_v23, %v5280_v24  ;;  %v2289_v57 = vld [vmem:[#allocation6 + $0x30] sm:$0xff]  ;;  %v2290_v23 = vld [vmem:[#allocation6 + $0x38] sm:$0xff] }
 0xa80   :  { %v5360_v12 = vadd.f32 %v1869_v58, %v1868_v10 }
 0xa81   :  { %v1867_v50 = vpop.permute.xlu1 %1866 }
 0xa82   :  { %4469 = vtanh.f32 %v5360_v12 }
 0xa8c   :  { %v4470_v14 = vpop.eup %4469 }
 0xa8d   :  { %v1872_v38 = vmul.f32 %v4470_v14, %v1867_v50 }
 0xa8f   :  { %3557 = vmatmul.mubr.f32.vlgmr.msra.gmra.mrb[20].mxu0 %v1872_v38  ;;  %3627 = vmatmul.mubr.f32.vlgmr.msra.gmra.mrb[14].mxu1 %v1872_v38 }
 0xa90   :  { %4216 = vmatpush3.bf16.msra.mxu0 %v4874_v30  ;;  %3591 = vmatprep.mubr.msk.f32.mxu0 %vm4575_vm0, %v4576_v1 }
 0xa91   :  { %4217 = vmatprep.subr.bf16.mxu0 %v4574_v0  ;;  %4264 = vmatpush3.bf16.msra.mxu1 %v4796_v32 }
 0xa92   :  { %4265 = vmatprep.subr.bf16.mxu1 %v4574_v0  ;;  %3661 = vmatprep.mubr.msk.f32.mxu1 %vm4575_vm0, %v4576_v1 }
 0xa94   :  { %4219 = vmatpush3.bf16.msra.mxu0 %v4877_v36 }
 0xa95   :  { %4220 = vmatprep.subr.bf16.mxu0 %v4574_v0  ;;  %4267 = vmatpush3.bf16.msra.mxu1 %v4799_v34 }
 0xa96   :  { %4268 = vmatprep.subr.bf16.mxu1 %v4574_v0 }
 0xa98   :  { %4222 = vmatpush3.bf16.msra.mxu0 %v4887_v42 }
 0xa99   :  { %4223 = vmatprep.subr.bf16.mxu0 %v4574_v0  ;;  %4270 = vmatpush3.bf16.msra.mxu1 %v4803_v37 }
 0xa9a   :  { %4271 = vmatprep.subr.bf16.mxu1 %v4574_v0 }
 0xa9c   :  { %4225 = vmatpush3.bf16.msra.mxu0 %v4893_v45 }
 0xa9d   :  { %v1773_v32 = vpop.permute.xlu0 %1772  ;;  %v1775_v18 = vpop.permute.xlu1 %1774  ;;  %4226 = vmatprep.subr.bf16.mxu0 %v4574_v0  ;;  %4273 = vmatpush3.bf16.msra.mxu1 %v4816_v51 }
 0xa9e   :  { %v1778_v34 = vmul.f32 %v1773_v32, %v5304_v35  ;;  %v1779_v20 = vmul.f32 %v1775_v18, %v1771_v2  ;;  %4274 = vmatprep.subr.bf16.mxu1 %v4574_v0  ;;  %v2288_v2 = vld [vmem:[#allocation6 + $0x28] sm:$0xff]  ;;  %v2291_v32 = vld [vmem:[#allocation6 + $0x40] sm:$0xff] }
 0xa9f   :  { %v2292_v18 = vld [vmem:[#allocation6 + $0x48] sm:$0xff] }
 0xaa0   :  { %v5384_v9 = vadd.f32 %v1779_v20, %v1778_v34  ;;  %4228 = vmatpush3.bf16.msra.mxu0 %v4899_v48  ;;  %v4323_v34 = vpack.c.bf16 %v2292_v18, %v2291_v32  ;;  %v2293_v20 = vld [vmem:[#allocation6 + $0x50] sm:$0xff] }
 0xaa1   :  { %4229 = vmatprep.subr.bf16.mxu0 %v4574_v0  ;;  %4276 = vmatpush3.bf16.msra.mxu1 %v4820_v55  ;;  %v1777_v51 = vpop.permute.xlu0 %1776 }
 0xaa2   :  { %4471 = vtanh.f32 %v5384_v9  ;;  %4277 = vmatprep.subr.bf16.mxu1 %v4574_v0 }
 0xaa4   :  { %4231 = vmatpush3.bf16.msra.mxu0 %v4905_v52 }
 0xaa5   :  { %4232 = vmatprep.subr.bf16.mxu0 %v4574_v0  ;;  %4279 = vmatpush3.bf16.msra.mxu1 %v4831_v60  ;;  %v225_v60 = vadd.f32 %v5264_v62, %v4953_v4 }
 0xaa6   :  { %4280 = vmatprep.subr.bf16.mxu1 %v4574_v0 }
 0xaa8   :  { %4234 = vmatpush3.bf16.msra.mxu0 %v4911_v56 }
 0xaa9   :  { %4235 = vmatprep.subr.bf16.mxu0 %v4574_v0  ;;  %4282 = vmatpush3.bf16.msra.mxu1 %v4847_v6 }
 0xaaa   :  { %4283 = vmatprep.subr.bf16.mxu1 %v4574_v0 }
 0xaac   :  { %v4472_v37 = vpop.eup %4471  ;;  %4237 = vmatpush3.bf16.msra.mxu0 %v4917_v59 }
 0xaad   :  { %v1782_v55 = vmul.f32 %v4472_v37, %v1777_v51  ;;  %4285 = vmatpush3.bf16.msra.mxu1 %v4862_v15  ;;  %4310 = vmatprep.subr.bf16.mxu0 %v4574_v0  ;;  %v2296_v51 = vld [vmem:[#allocation6 + $0x68] sm:$0xff] }
 0xaae   :  { %4286 = vmatprep.subr.bf16.mxu1 %v4574_v0 }
 0xaaf   :  { %3592 = vmatmul.mubr.f32.vlgmr.msra.gmra.mrb[20].mxu0 %v1782_v55 }
 0xab0   :  { %3731 = vmatprep.mubr.msk.f32.mxu0 %vm4575_vm0, %v4576_v1 }
 0xb62   :  { %v2099_v6 = vpop.f32.mrb[14].mxu1 }
 0xb63   :  { %v2103_v24 = vadd.f32 %v2099_v6, %v225_v60  ;;  %v3628_v26 = vpop.f32.mrb[15].mxu1 }
 0xb64   :  { %v2298_v26 = vld [vmem:[#allocation6 + $0x78] sm:$0xff] }
 0xb65   :  { %v2408_v17 = vmul.f32 -1.442695, %v2103_v24 }
 0xb67   :  { %4473 = vpow2.f32 %v2408_v17 }
 0xb68   :  { %4475 = vtanh.f32 %v2103_v24  ;;  %v2297_v24 = vld [vmem:[#allocation6 + $0x70] sm:$0xff] }
 0xb71   :  { %v4474_v27 = vpop.eup %4473 }
 0xb72   :  { %v2108_v11 = vadd.f32 1.0, %v4474_v27  ;;  %v4476_v15 = vpop.eup %4475  ;;  %v4332_v27 = vpack.c.bf16 %v2298_v26, %v2297_v24 }
 0xb74   :  { %4477 = vrcp.f32 %v2108_v11 }
 0xb7e   :  { %v4478_v21 = vpop.eup %4477 }
 0xb7f   :  { %v2111_v31 = vsel %vm4837_vm5, %v4476_v15, %v4478_v21 }
 0xb80   :  { %2114 = vrot.lane.b32.xlu0 %v2111_v31, %s4579_s29  ;;  %2112 = vrot.lane.b32.xlu1 %v2111_v31, %s4578_s26 }
 0xb82   :  { %v2009_v29 = vpop.f32.mrb[20].mxu0 }
 0xb83   :  { %v4340_v4 = vadd.f32 %v5350_v8, %v2009_v29  ;;  %v3593_v62 = vpop.f32.mrb[21].mxu0 }
 0xb84   :  { %2116 = vrot.lane.b32.xlu1 %v2111_v31, %s4577_s12 }
 0xb85   :  { %v2407_v35 = vmul.f32 -1.442695, %v4340_v4 }
 0xb87   :  { %4479 = vpow2.f32 %v2407_v35 }
 0xb88   :  { %4481 = vtanh.f32 %v4340_v4 }
 0xb91   :  { %v4480_v33 = vpop.eup %4479 }
 0xb92   :  { %v2018_v39 = vadd.f32 1.0, %v4480_v33  ;;  %v4482_v41 = vpop.eup %4481 }
 0xb94   :  { %4483 = vrcp.f32 %v2018_v39 }
 0xb9e   :  { %v4484_v5 = vpop.eup %4483 }
 0xb9f   :  { %v2021_v7 = vsel %vm4837_vm5, %v4482_v41, %v4484_v5 }
 0xba0   :  { %2024 = vrot.lane.b32.xlu1 %v2021_v7, %s4579_s29  ;;  %2022 = vrot.lane.b32.xlu0 %v2021_v7, %s4578_s26 }
 0xba4   :  { %2026 = vrot.lane.b32.xlu0 %v2021_v7, %s4577_s12 }
 0xbf2   :  { %v2115_v13 = vpop.permute.xlu0 %2114  ;;  %v2113_v16 = vpop.permute.xlu1 %2112 }
 0xbf3   :  { %v2119_v19 = vmul.f32 %v2115_v13, %v2111_v31  ;;  %v2118_v43 = vmul.f32 %v2113_v16, %v5360_v12 }
 0xbf5   :  { %v2120_v22 = vadd.f32 %v2119_v19, %v2118_v43 }
 0xbf6   :  { %v2117_v25 = vpop.permute.xlu1 %2116 }
 0xbf7   :  { %4485 = vtanh.f32 %v2120_v22 }
 0xc01   :  { %v4486_v44 = vpop.eup %4485 }
 0xc02   :  { %v2122_v46 = vmul.f32 %v4486_v44, %v2117_v25 }
 0xc04   :  { %3662 = vmatmul.mubr.f32.vlgmr.msra.gmra.mrb[16].mxu1 %v2122_v46 }
 0xc05   :  { %4288 = vmatpush3.bf16.msra.mxu1 %v4874_v30  ;;  %3696 = vmatprep.mubr.msk.f32.mxu1 %vm4575_vm0, %v4576_v1 }
 0xc06   :  { %4289 = vmatprep.subr.bf16.mxu1 %v4574_v0 }
 0xc09   :  { %4291 = vmatpush3.bf16.msra.mxu1 %v4877_v36 }
 0xc0a   :  { %4292 = vmatprep.subr.bf16.mxu1 %v4574_v0 }
 0xc0d   :  { %4294 = vmatpush3.bf16.msra.mxu1 %v4887_v42 }
 0xc0e   :  { %4295 = vmatprep.subr.bf16.mxu1 %v4574_v0 }
 0xc11   :  { %4297 = vmatpush3.bf16.msra.mxu1 %v4893_v45 }
 0xc12   :  { %v2025_v28 = vpop.permute.xlu1 %2024  ;;  %v2023_v61 = vpop.permute.xlu0 %2022  ;;  %4298 = vmatprep.subr.bf16.mxu1 %v4574_v0 }
 0xc13   :  { %v2029_v30 = vmul.f32 %v2025_v28, %v2021_v7  ;;  %v2028_v47 = vmul.f32 %v2023_v61, %v5384_v9  ;;  %v2294_v9 = vld [vmem:[#allocation6 + $0x58] sm:$0xff] }
 0xc14   :  { %v4326_v37 = vpack.c.bf16 %v2294_v9, %v2293_v20 }
 0xc15   :  { %v5430_v1 = vadd.f32 %v2029_v30, %v2028_v47  ;;  %4300 = vmatpush3.bf16.msra.mxu1 %v4899_v48  ;;  %v2284_v48 = vld [vmem:[#allocation6 + $0x8] sm:$0xff] }
 0xc16   :  { %4301 = vmatprep.subr.bf16.mxu1 %v4574_v0  ;;  %v2027_v42 = vpop.permute.xlu0 %2026  ;;  %v4311_v40 = vpack.c.bf16 %v2284_v48, %v2283_v49 }
 0xc17   :  { %4487 = vtanh.f32 %v5430_v1 }
 0xc18   :  { %4312 = vmatpush3.bf16.msra.mxu0 %v4311_v40 }
 0xc19   :  { %4303 = vmatpush3.bf16.msra.mxu1 %v4905_v52  ;;  %4313 = vmatprep.subr.bf16.mxu0 %v4574_v0  ;;  %v2287_v52 = vld [vmem:[#allocation6 + $0x20] sm:$0xff] }
 0xc1a   :  { %4304 = vmatprep.subr.bf16.mxu1 %v4574_v0 }
 0xc1c   :  { %4315 = vmatpush3.bf16.msra.mxu0 %v4314_v54 }
 0xc1d   :  { %4306 = vmatpush3.bf16.msra.mxu1 %v4911_v56  ;;  %v4317_v56 = vpack.c.bf16 %v2288_v2, %v2287_v52  ;;  %4316 = vmatprep.subr.bf16.mxu0 %v4574_v0 }
 0xc1e   :  { %4307 = vmatprep.subr.bf16.mxu1 %v4574_v0 }
 0xc20   :  { %4318 = vmatpush3.bf16.msra.mxu0 %v4317_v56 }
 0xc21   :  { %v4488_v36 = vpop.eup %4487  ;;  %4309 = vmatpush3.bf16.msra.mxu1 %v4917_v59  ;;  %v4320_v59 = vpack.c.bf16 %v2290_v23, %v2289_v57  ;;  %4319 = vmatprep.subr.bf16.mxu0 %v4574_v0 }
 0xc22   :  { %v2032_v45 = vmul.f32 %v4488_v36, %v2027_v42 }
 0xc24   :  { %3697 = vmatmul.mubr.f32.vlgmr.msra.gmra.mrb[16].mxu1 %v2032_v45  ;;  %4321 = vmatpush3.bf16.msra.mxu0 %v4320_v59 }
 0xc25   :  { %4322 = vmatprep.subr.bf16.mxu0 %v4574_v0 }
 0xc28   :  { %4324 = vmatpush3.bf16.msra.mxu0 %v4323_v34 }
 0xc29   :  { %4325 = vmatprep.subr.bf16.mxu0 %v4574_v0 }
 0xc2c   :  { %4327 = vmatpush3.bf16.msra.mxu0 %v4326_v37 }
 0xc2d   :  { %4328 = vmatprep.subr.bf16.mxu0 %v4574_v0 }
 0xcf7   :  { %v2259_v58 = vpop.f32.mrb[16].mxu1 }
 0xcf8   :  { %v4341_v10 = vadd.f32 %v5350_v8, %v2259_v58  ;;  %v3698_v12 = vpop.f32.mrb[17].mxu1  ;;  %v2295_v8 = vld [vmem:[#allocation6 + $0x60] sm:$0xff] }
 0xcf9   :  { %v4329_v55 = vpack.c.bf16 %v2296_v51, %v2295_v8 }
 0xcfa   :  { %v2409_v14 = vmul.f32 -1.442695, %v4341_v10 }
 0xcfb   :  { %4330 = vmatpush3.bf16.msra.mxu0 %v4329_v55 }
 0xcfc   :  { %4489 = vpow2.f32 %v2409_v14  ;;  %4331 = vmatprep.subr.bf16.mxu0 %v4574_v0 }
 0xcfd   :  { %4491 = vtanh.f32 %v4341_v10 }
 0xcff   :  { %4333 = vmatpush3.bf16.msra.mxu0 %v4332_v27 }
 0xd06   :  { %v4490_v50 = vpop.eup %4489 }
 0xd07   :  { %v2268_v38 = vadd.f32 1.0, %v4490_v50  ;;  %v4492_v60 = vpop.eup %4491 }
 0xd09   :  { %4493 = vrcp.f32 %v2268_v38 }
 0xd13   :  { %v4494_v6 = vpop.eup %4493 }
 0xd14   :  { %v2271_v17 = vsel %vm4837_vm5, %v4492_v60, %v4494_v6 }
 0xd15   :  { %2274 = vrot.lane.b32.xlu0 %v2271_v17, %s4579_s29  ;;  %2272 = vrot.lane.b32.xlu1 %v2271_v17, %s4578_s26 }
 0xd19   :  { %2276 = vrot.lane.b32.xlu1 %v2271_v17, %s4577_s12 }
 0xd87   :  { %v2275_v11 = vpop.permute.xlu0 %2274  ;;  %v2273_v15 = vpop.permute.xlu1 %2272 }
 0xd88   :  { %v2279_v21 = vmul.f32 %v2275_v11, %v2271_v17  ;;  %v2278_v31 = vmul.f32 %v2273_v15, %v5430_v1 }
 0xd8a   :  { %v2280_v29 = vadd.f32 %v2279_v21, %v2278_v31 }
 0xd8b   :  { %v2277_v4 = vpop.permute.xlu1 %2276 }
 0xd8c   :  { %4495 = vtanh.f32 %v2280_v29 }
 0xd96   :  { %v4496_v0 = vpop.eup %4495 }
 0xd97   :  { %v2282_v62 = vmul.f32 %v4496_v0, %v2277_v4 }
 0xd99   :  { %3732 = vmatmul.mubr.f32.vlgmr.msra.gmra.mrb[22].mxu0 %v2282_v62 }
 0xe6c   :  { %v2372_v35 = vpop.f32.mrb[22].mxu0 }
 0xe6d   :  { %v2373_v33 = vadd.f32 %v2410_v63, %v2372_v35  ;;  %v3733_v39 = vpop.f32.mrb[23].mxu0 }
 0xe6f   :  { %2376 = vst [vmem:[%s5469_s9] sm:$0xff] %v2373_v33 }
 0xe70   :  { %2381 = vsyncpa [#allocation3], 1 }
 0xe71   :  { %2382 = vsyncpa [#allocation5], 1 }

</bundles_post_ra>
